<compile_context>
chip_gen: v7x
topology: tpu7x:2x2x1
jax: 0.10.0
libtpu: 0.0.40
codegen_flags: <defaults>
</compile_context>

<pallas_src>
import functools

import jax
import jax.numpy as jnp
from jax.experimental import pallas as pl
from jax.experimental.pallas import tpu as pltpu


def _round_up(x, m):
    return (x + m - 1) // m * m


# --------------------- fused LSTM + attention + decode ----------------------
# grid = (batch_tiles, time_chunks); batch axis "parallel", time "arbitrary".
# Per grid step: one hoisted (Tc*Bt, D) x (D, 4H) input-projection matmul,
# then a statically unrolled recurrence over Tc steps (only h @ W_hh per step)
# with h/c carried in VMEM scratch.  The whole (Tpad, Bt, H) activation is kept
# in VMEM scratch; at the last time chunk the similarity attention, weighted
# sum, decoder and LogSoftmax run in-kernel and write the three outputs.
def fused_kernel(x_ref, wih_ref, whh_ref, b_ref, h0_ref, c0_ref, len_ref,
                 wT_ref, wdT_ref, bd_ref,
                 dec_ref, m_ref, a_ref,
                 h_sc, c_sc, out_sc, *, t_real):
    Tc, Bt, D = x_ref.shape
    H = h_sc.shape[-1]
    chunk = pl.program_id(1)

    @pl.when(chunk == 0)
    def _():
        h_sc[...] = h0_ref[...]
        c_sc[...] = c0_ref[...]

    # Hoisted input projection for the whole time chunk (one dense MXU matmul,
    # bf16 operands, f32 accumulate).
    xp = (jnp.dot(x_ref[...].reshape(Tc * Bt, D), wih_ref[...],
                  preferred_element_type=jnp.float32)
          + b_ref[...])                                           # (Tc*Bt, 4H)

    whh = whh_ref[...]                                            # bf16 (H,4H)
    h = h_sc[...]
    c = c_sc[...]
    lens = len_ref[...]                                           # (Bt, 1) i32

    # Length mask for the whole chunk, hoisted out of the unrolled loop.
    t_idx = jax.lax.broadcasted_iota(jnp.int32, (Tc, Bt, 1), 0)
    mask_chunk = lens[None, :, :] > (chunk * Tc + t_idx)          # (Tc, Bt, 1)

    # Statically unrolled recurrence: only the tiny h @ W_hh per step.
    for tt in range(Tc):
        gates = xp[tt * Bt:(tt + 1) * Bt, :] + jnp.dot(
            h.astype(jnp.bfloat16), whh,
            preferred_element_type=jnp.float32)                   # (Bt, 4H)

        # PyTorch LSTM gate order: i, f, g, o  (gate math kept in f32).
        i_g = jax.nn.sigmoid(gates[:, 0:H])
        f_g = jax.nn.sigmoid(gates[:, H:2 * H])
        g_g = jnp.tanh(gates[:, 2 * H:3 * H])
        o_g = jax.nn.sigmoid(gates[:, 3 * H:4 * H])

        c_new = f_g * c + i_g * g_g
        h_new = o_g * jnp.tanh(c_new)

        # pack_padded_sequence semantics: state freezes at t >= length,
        # padded output rows are zero.
        mask = mask_chunk[tt]                                     # (Bt, 1)
        h = jnp.where(mask, h_new, h)
        c = jnp.where(mask, c_new, c)
        out_sc[chunk * Tc + tt] = jnp.where(mask, h_new,
                                            jnp.zeros_like(h_new))

    h_sc[...] = h
    c_sc[...] = c

    # ---- attention + decode epilogue (runs once, on the last time chunk) ----
    @pl.when(chunk == pl.num_programs(1) - 1)
    def _():
        hN = h                                                    # (Bt, H)
        out_all = out_sc[...]                                     # (Tpad,Bt,H)
        t_pad = out_all.shape[0]

        # similarity attention: A[b,t] = out[b,t,:] @ W @ hN[b,:]
        # u[b,:] = hN[b,:] @ W.T   (wT_ref holds W.T, bf16 -> f32 acc)
        u = jnp.dot(hN.astype(jnp.bfloat16), wT_ref[...],
                    preferred_element_type=jnp.float32)           # (Bt, H)

        # scores in time-major layout, then one tiny (Tpad,Bt) transpose so the
        # softmax runs lane-dense over T and A stores without a transpose.
        scores_tb = jnp.sum(out_all * u[None, :, :], axis=-1)     # (Tpad, Bt)
        if t_pad > t_real:
            # padded timesteps do not exist in the reference module: drop them
            # from the softmax.  (length[b] <= t < t_real keep score 0, exactly
            # as PyTorch where padded rows of `out` are zero.)
            t_ids = jax.lax.broadcasted_iota(jnp.int32, (t_pad, Bt), 0)
            scores_tb = jnp.where(t_ids < t_real, scores_tb, -1e30)

        scores_bt = jnp.transpose(scores_tb)                      # (Bt, Tpad)
        smax = jnp.max(scores_bt, axis=-1, keepdims=True)
        e = jnp.exp(scores_bt - smax)
        a_bt = e * pl.reciprocal(jnp.sum(e, axis=-1, keepdims=True),
                                 approx=False)                    # softmax(T)

        # M[b,h] = sum_t A[b,t] * out[t,b,h]
        a_tb = jnp.transpose(a_bt)                                # (Tpad, Bt)
        m = jnp.sum(a_tb[:, :, None] * out_all, axis=0)           # (Bt, H)

        # Decoder into a lane-padded (Bt, Cp) buffer; padded bias lanes are
        # -1e30 and padded weight columns exactly zero, so the in-kernel
        # LogSoftmax over Cp equals LogSoftmax over the real C.
        logits = (jnp.dot(m.astype(jnp.bfloat16), wdT_ref[...],
                          preferred_element_type=jnp.float32)
                  + bd_ref[...])                                  # (Bt, Cp)
        lmax = jnp.max(logits, axis=-1, keepdims=True)
        lse = jnp.log(jnp.sum(jnp.exp(logits - lmax), axis=-1,
                              keepdims=True)) + lmax

        dec_ref[...] = logits - lse
        m_ref[...] = m
        a_ref[...] = a_bt


def run_fused(x_tbd, w_ih, w_hh, b, h0, c0, lens, wT, wdT_pad, bd_pad,
              *, t_real, time_chunk, batch_tile=8):
    Tpad, Bp, D = x_tbd.shape
    H = h0.shape[-1]
    Cp = wdT_pad.shape[-1]
    Tc = time_chunk
    assert Tpad % Tc == 0
    Bt = min(batch_tile, Bp)
    assert Bp % Bt == 0
    nb, nt = Bp // Bt, Tpad // Tc

    kernel = functools.partial(fused_kernel, t_real=t_real)

    dec, m, a = pl.pallas_call(
        kernel,
        grid=(nb, nt),
        in_specs=[
            pl.BlockSpec((Tc, Bt, D), lambda bi, ti: (ti, bi, 0)),  # x chunk
            pl.BlockSpec((D, 4 * H), lambda bi, ti: (0, 0)),        # W_ih
            pl.BlockSpec((H, 4 * H), lambda bi, ti: (0, 0)),        # W_hh
            pl.BlockSpec((1, 4 * H), lambda bi, ti: (0, 0)),        # bias
            pl.BlockSpec((Bt, H), lambda bi, ti: (bi, 0)),          # h0
            pl.BlockSpec((Bt, H), lambda bi, ti: (bi, 0)),          # c0
            pl.BlockSpec((Bt, 1), lambda bi, ti: (bi, 0)),          # lengths
            pl.BlockSpec((H, H), lambda bi, ti: (0, 0)),            # W.T
            pl.BlockSpec((H, Cp), lambda bi, ti: (0, 0)),           # Wd.T pad
            pl.BlockSpec((1, Cp), lambda bi, ti: (0, 0)),           # bd pad
        ],
        out_specs=(
            pl.BlockSpec((Bt, Cp), lambda bi, ti: (bi, 0)),         # decoded
            pl.BlockSpec((Bt, H), lambda bi, ti: (bi, 0)),          # M
            pl.BlockSpec((Bt, Tpad), lambda bi, ti: (bi, 0)),       # A
        ),
        out_shape=(
            jax.ShapeDtypeStruct((Bp, Cp), jnp.float32),
            jax.ShapeDtypeStruct((Bp, H), jnp.float32),
            jax.ShapeDtypeStruct((Bp, Tpad), jnp.float32),
        ),
        scratch_shapes=[
            pltpu.VMEM((Bt, H), jnp.float32),          # h carry
            pltpu.VMEM((Bt, H), jnp.float32),          # c carry
            pltpu.VMEM((Tpad, Bt, H), jnp.float32),    # full activation (VMEM only)
        ],
        compiler_params=pltpu.CompilerParams(
            # batch tiles are independent (v7x second TC takes half of them for
            # Bp >= 16); the time recurrence carries scratch -> "arbitrary".
            dimension_semantics=("parallel", "arbitrary"),
            vmem_limit_bytes=32 * 1024 * 1024),
    )(x_tbd, w_ih, w_hh, b, h0, c0, lens, wT, wdT_pad, bd_pad)
    return dec, m, a


# ------------------------------ full forward --------------------------------
def self_attentive_rnn_forward(params, inp, lengths, *, time_chunk=32):
    B, T = inp.shape
    H = params["h0"].shape[-1]
    C = params["wd"].shape[0]
    Bp = _round_up(B, 8)                      # sublane-pad batch
    Cp = _round_up(C, 128)                    # lane-pad classes
    Tc = min(time_chunk, _round_up(T, 8))     # don't over-pad tiny sequences
    Tpad = _round_up(T, Tc)                   # pad T instead of shrinking Tc

    # Embedding gather produced directly time-major (no large (B,T,D) HBM
    # transpose); batch/time padded; activations cast to bf16 for the MXU.
    x_tbd = jnp.take(params["embed"], jnp.transpose(inp), axis=0)   # (T, B, D)
    x_tbd = jnp.pad(x_tbd, ((0, Tpad - T), (0, Bp - B), (0, 0)))
    x_tbd = x_tbd.astype(jnp.bfloat16)

    h0 = jnp.pad(params["h0"], ((0, Bp - B), (0, 0)))
    c0 = jnp.pad(params["c0"], ((0, Bp - B), (0, 0)))
    lens = jnp.pad(lengths.astype(jnp.int32).reshape(-1, 1),
                   ((0, Bp - B), (0, 0)))          # padded rows: length 0

    # bf16 matmul operands (f32 accumulation happens in-kernel).
    w_ih = params["w_ih"].astype(jnp.bfloat16)
    w_hh = params["w_hh"].astype(jnp.bfloat16)
    wT = jnp.transpose(params["W"]).astype(jnp.bfloat16)             # (H, H)
    wdT_pad = jnp.zeros((H, Cp), jnp.float32).at[:, :C].set(
        jnp.transpose(params["wd"])).astype(jnp.bfloat16)
    bd_pad = jnp.full((1, Cp), -1e30, jnp.float32).at[0, :C].set(params["bd"])

    dec_p, m_p, a_p = run_fused(
        x_tbd, w_ih, w_hh, params["b"], h0, c0, lens, wT, wdT_pad, bd_pad,
        t_real=T, time_chunk=Tc, batch_tile=8)

    # strip batch / class / time padding
    return dec_p[:B, :C], m_p[:B], a_p[:B, :T]      # == (probs, M, A)


if __name__ == "__main__":
    # Small shapes consistent with the module (input_size=D, hidden_size=H,
    # num_layers=1, bidirectional=False, num_classes=2).
    B, T, D, H, C, VOCAB = 2, 8, 128, 128, 2, 50

    key = jax.random.PRNGKey(0)
    ks = jax.random.split(key, 10)

    params = {
        "embed": jax.random.normal(ks[0], (VOCAB, D), jnp.float32),
        "w_ih":  jax.random.normal(ks[1], (D, 4 * H), jnp.float32) * 0.05,
        "w_hh":  jax.random.normal(ks[2], (H, 4 * H), jnp.float32) * 0.05,
        # single combined bias == b_ih + b_hh of the PyTorch LSTM
        "b":     jax.random.normal(ks[3], (1, 4 * H), jnp.float32) * 0.05,
        # self.hiddens: randn(num_layers, batch, hidden) for (h0, c0)
        "h0":    jax.random.normal(ks[4], (B, H), jnp.float32),
        "c0":    jax.random.normal(ks[5], (B, H), jnp.float32),
        # self.W = nn.Parameter(torch.randn(H, H))
        "W":     jax.random.normal(ks[6], (H, H), jnp.float32),
        # self.decoder = nn.Linear(H, num_classes)
        "wd":    jax.random.normal(ks[7], (C, H), jnp.float32) * 0.05,
        "bd":    jax.random.normal(ks[8], (C,), jnp.float32) * 0.05,
    }

    inp = jax.random.randint(ks[9], (B, T), 0, VOCAB, dtype=jnp.int32)
    lengths = jnp.array([T, T - 2], dtype=jnp.int32)   # sorted descending

    fwd = jax.jit(self_attentive_rnn_forward)
    decoded, M, A = fwd(params, inp, lengths)
    jax.block_until_ready((decoded, M, A))

    assert decoded.shape == (B, C)
    assert M.shape == (B, H)
    assert A.shape == (B, T)
    assert bool(jnp.all(jnp.isfinite(decoded)))
    assert bool(jnp.all(jnp.isfinite(M)))
    assert bool(jnp.all(jnp.isfinite(A)))
    # attention weights are a softmax over time -> rows sum to ~1
    assert bool(jnp.all(jnp.abs(jnp.sum(A, axis=1) - 1.0) < 1e-3))
    print("KERNEL_OK")
</pallas_src>

<mosaic_0001>
module attributes {stable_mosaic.version = 11 : i64} {
  func.func @fused_kernel(%arg0: i32, %arg1: i32, %arg2: memref<8x8x128xbf16, #tpu.memory_space<vmem>>, %arg3: memref<128x512xbf16, #tpu.memory_space<vmem>>, %arg4: memref<128x512xbf16, #tpu.memory_space<vmem>>, %arg5: memref<1x512xf32, #tpu.memory_space<vmem>>, %arg6: memref<8x128xf32, #tpu.memory_space<vmem>>, %arg7: memref<8x128xf32, #tpu.memory_space<vmem>>, %arg8: memref<8x1xi32, #tpu.memory_space<vmem>>, %arg9: memref<128x128xbf16, #tpu.memory_space<vmem>>, %arg10: memref<128x128xbf16, #tpu.memory_space<vmem>>, %arg11: memref<1x128xf32, #tpu.memory_space<vmem>>, %arg12: memref<8x128xf32, #tpu.memory_space<vmem>>, %arg13: memref<8x128xf32, #tpu.memory_space<vmem>>, %arg14: memref<8x8xf32, #tpu.memory_space<vmem>>, %arg15: memref<8x128xf32, #tpu.memory_space<vmem>>, %arg16: memref<8x128xf32, #tpu.memory_space<vmem>>, %arg17: memref<8x8x128xf32, #tpu.memory_space<vmem>>) attributes {dimension_semantics = [#tpu.dimension_semantics<parallel>, #tpu.dimension_semantics<arbitrary>], iteration_bounds = array<i64: 1, 1>, scalar_prefetch = 0 : i64, scratch_operands = 3 : i64, tpu.core_type = #tpu.core_type<tc>, window_params = [{transform_indices = @transform_0, window_bounds = array<i64: 8, 8, 128>}, {pipeline_mode = #tpu.pipeline_mode<synchronous>, transform_indices = @transform_1, window_bounds = array<i64: 128, 512>}, {pipeline_mode = #tpu.pipeline_mode<synchronous>, transform_indices = @transform_2, window_bounds = array<i64: 128, 512>}, {pipeline_mode = #tpu.pipeline_mode<synchronous>, transform_indices = @transform_3, window_bounds = array<i64: 1, 512>}, {transform_indices = @transform_4, window_bounds = array<i64: 8, 128>}, {transform_indices = @transform_5, window_bounds = array<i64: 8, 128>}, {transform_indices = @transform_6, window_bounds = array<i64: 8, 1>}, {pipeline_mode = #tpu.pipeline_mode<synchronous>, transform_indices = @transform_7, window_bounds = array<i64: 128, 128>}, {pipeline_mode = #tpu.pipeline_mode<synchronous>, transform_indices = @transform_8, window_bounds = array<i64: 128, 128>}, {pipeline_mode = #tpu.pipeline_mode<synchronous>, transform_indices = @transform_9, window_bounds = array<i64: 1, 128>}, {transform_indices = @transform_10, window_bounds = array<i64: 8, 128>}, {transform_indices = @transform_11, window_bounds = array<i64: 8, 128>}, {transform_indices = @transform_12, window_bounds = array<i64: 8, 8>}]} {
    %c0_i32 = arith.constant 0 : i32
    %0 = arith.cmpi eq, %arg1, %c0_i32 : i32
    %1 = arith.extui %0 : i1 to i32
    %c0_i32_0 = arith.constant 0 : i32
    %2 = arith.cmpi ne, %1, %c0_i32_0 : i32
    scf.if %2 {
      %c0_86 = arith.constant 0 : index
      %c0_87 = arith.constant 0 : index
      %402 = vector.load %arg6[%c0_86, %c0_87] : memref<8x128xf32, #tpu.memory_space<vmem>>, vector<8x128xf32>
      %c0_88 = arith.constant 0 : index
      %c0_89 = arith.constant 0 : index
      %403 = vector.load %arg15[%c0_88, %c0_89] : memref<8x128xf32, #tpu.memory_space<vmem>>, vector<8x128xf32>
      tpu.vector_store %arg15[%c0_88, %c0_89], %402 {strides = array<i32>} : memref<8x128xf32, #tpu.memory_space<vmem>>, vector<8x128xf32>,
      %c0_90 = arith.constant 0 : index
      %c0_91 = arith.constant 0 : index
      %404 = vector.load %arg7[%c0_90, %c0_91] : memref<8x128xf32, #tpu.memory_space<vmem>>, vector<8x128xf32>
      %c0_92 = arith.constant 0 : index
      %c0_93 = arith.constant 0 : index
      %405 = vector.load %arg16[%c0_92, %c0_93] : memref<8x128xf32, #tpu.memory_space<vmem>>, vector<8x128xf32>
      tpu.vector_store %arg16[%c0_92, %c0_93], %404 {strides = array<i32>} : memref<8x128xf32, #tpu.memory_space<vmem>>, vector<8x128xf32>,
    } else {
    }
    %c0 = arith.constant 0 : index
    %c0_1 = arith.constant 0 : index
    %c0_2 = arith.constant 0 : index
    %3 = vector.load %arg2[%c0, %c0_1, %c0_2] : memref<8x8x128xbf16, #tpu.memory_space<vmem>>, vector<8x8x128xbf16>
    %4 = vector.shape_cast %3 : vector<8x8x128xbf16> to vector<64x128xbf16>
    %c0_3 = arith.constant 0 : index
    %c0_4 = arith.constant 0 : index
    %5 = vector.load %arg3[%c0_3, %c0_4] : memref<128x512xbf16, #tpu.memory_space<vmem>>, vector<128x512xbf16>
    %cst = arith.constant dense<0.000000e+00> : vector<64x512xf32>
    %6 = tpu.matmul %4, %5, %cst {dimension_numbers = #tpu.dot_dimension_numbers<[1], [0], [0], [1], [0, 0, 1, 1], [], []>} : vector<64x128xbf16>, vector<128x512xbf16>, vector<64x512xf32> -> vector<64x512xf32>
    %c0_5 = arith.constant 0 : index
    %c0_6 = arith.constant 0 : index
    %7 = vector.load %arg5[%c0_5, %c0_6] : memref<1x512xf32, #tpu.memory_space<vmem>>, vector<1x512xf32>
    %8 = vector.broadcast %7 : vector<1x512xf32> to vector<64x512xf32>
    %9 = arith.addf %6, %8 : vector<64x512xf32>
    %c0_7 = arith.constant 0 : index
    %c0_8 = arith.constant 0 : index
    %10 = vector.load %arg4[%c0_7, %c0_8] : memref<128x512xbf16, #tpu.memory_space<vmem>>, vector<128x512xbf16>
    %c0_9 = arith.constant 0 : index
    %c0_10 = arith.constant 0 : index
    %11 = vector.load %arg15[%c0_9, %c0_10] : memref<8x128xf32, #tpu.memory_space<vmem>>, vector<8x128xf32>
    %c0_11 = arith.constant 0 : index
    %c0_12 = arith.constant 0 : index
    %12 = vector.load %arg16[%c0_11, %c0_12] : memref<8x128xf32, #tpu.memory_space<vmem>>, vector<8x128xf32>
    %c0_13 = arith.constant 0 : index
    %c0_14 = arith.constant 0 : index
    %13 = vector.load %arg8[%c0_13, %c0_14] : memref<8x1xi32, #tpu.memory_space<vmem>>, vector<8x1xi32>
    %14 = tpu.iota {dimensions = array<i32: 0>} : vector<8x8x1xi32>
    %15 = vector.shape_cast %13 : vector<8x1xi32> to vector<1x8x1xi32>
    %c8_i32 = arith.constant 8 : i32
    %16 = arith.muli %arg1, %c8_i32 : i32
    %17 = vector.broadcast %16 : i32 to vector<8x8x1xi32>
    %18 = arith.addi %17, %14 : vector<8x8x1xi32>
    %19 = vector.broadcast %15 : vector<1x8x1xi32> to vector<8x8x1xi32>
    %20 = arith.cmpi sgt, %19, %18 : vector<8x8x1xi32>
    %21 = vector.extract_strided_slice %9 {offsets = [0, 0], sizes = [8, 512], strides = [1, 1]} : vector<64x512xf32> to vector<8x512xf32>
    %22 = arith.truncf %11 : vector<8x128xf32> to vector<8x128xbf16>
    %cst_15 = arith.constant dense<0.000000e+00> : vector<8x512xf32>
    %23 = tpu.matmul %22, %10, %cst_15 {dimension_numbers = #tpu.dot_dimension_numbers<[1], [0], [0], [1], [0, 0, 1, 1], [], []>} : vector<8x128xbf16>, vector<128x512xbf16>, vector<8x512xf32> -> vector<8x512xf32>
    %24 = arith.addf %21, %23 : vector<8x512xf32>
    %25 = vector.extract_strided_slice %24 {offsets = [0, 0], sizes = [8, 128], strides = [1, 1]} : vector<8x512xf32> to vector<8x128xf32>
    %26 = arith.negf %25 : vector<8x128xf32>
    %27 = math.exp %26 : vector<8x128xf32>
    %cst_16 = arith.constant 1.000000e+00 : f32
    %28 = vector.broadcast %cst_16 : f32 to vector<8x128xf32>
    %29 = arith.addf %28, %27 : vector<8x128xf32>
    %30 = arith.divf %28, %29 : vector<8x128xf32>
    %31 = vector.extract_strided_slice %24 {offsets = [0, 128], sizes = [8, 128], strides = [1, 1]} : vector<8x512xf32> to vector<8x128xf32>
    %32 = arith.negf %31 : vector<8x128xf32>
    %33 = math.exp %32 : vector<8x128xf32>
    %cst_17 = arith.constant 1.000000e+00 : f32
    %34 = vector.broadcast %cst_17 : f32 to vector<8x128xf32>
    %35 = arith.addf %34, %33 : vector<8x128xf32>
    %36 = arith.divf %34, %35 : vector<8x128xf32>
    %37 = vector.extract_strided_slice %24 {offsets = [0, 256], sizes = [8, 128], strides = [1, 1]} : vector<8x512xf32> to vector<8x128xf32>
    %38 = math.tanh %37 : vector<8x128xf32>
    %39 = vector.extract_strided_slice %24 {offsets = [0, 384], sizes = [8, 128], strides = [1, 1]} : vector<8x512xf32> to vector<8x128xf32>
    %40 = arith.negf %39 : vector<8x128xf32>
    %41 = math.exp %40 : vector<8x128xf32>
    %cst_18 = arith.constant 1.000000e+00 : f32
    %42 = vector.broadcast %cst_18 : f32 to vector<8x128xf32>
    %43 = arith.addf %42, %41 : vector<8x128xf32>
    %44 = arith.divf %42, %43 : vector<8x128xf32>
    %45 = arith.mulf %36, %12 : vector<8x128xf32>
    %46 = arith.mulf %30, %38 : vector<8x128xf32>
    %47 = arith.addf %45, %46 : vector<8x128xf32>
    %48 = math.tanh %47 : vector<8x128xf32>
    %49 = arith.mulf %44, %48 : vector<8x128xf32>
    %50 = vector.extract_strided_slice %20 {offsets = [0, 0, 0], sizes = [1, 8, 1], strides = [1, 1, 1]} : vector<8x8x1xi1> to vector<1x8x1xi1>
    %51 = vector.shape_cast %50 : vector<1x8x1xi1> to vector<8x1xi1>
    %52 = vector.shape_cast %51 : vector<8x1xi1> to vector<8x1xi1>
    %53 = vector.broadcast %52 : vector<8x1xi1> to vector<8x128xi1>
    %54 = arith.select %53, %49, %11 : vector<8x128xi1>, vector<8x128xf32>
    %55 = vector.shape_cast %51 : vector<8x1xi1> to vector<8x1xi1>
    %56 = vector.broadcast %55 : vector<8x1xi1> to vector<8x128xi1>
    %57 = arith.select %56, %47, %12 : vector<8x128xi1>, vector<8x128xf32>
    %cst_19 = arith.constant 0.000000e+00 : f32
    %58 = vector.broadcast %cst_19 : f32 to vector<8x128xf32>
    %59 = vector.shape_cast %51 : vector<8x1xi1> to vector<8x1xi1>
    %60 = vector.broadcast %59 : vector<8x1xi1> to vector<8x128xi1>
    %61 = arith.select %60, %49, %58 : vector<8x128xi1>, vector<8x128xf32>
    %c8_i32_20 = arith.constant 8 : i32
    %62 = arith.muli %arg1, %c8_i32_20 : i32
    %c0_i32_21 = arith.constant 0 : i32
    %63 = arith.addi %62, %c0_i32_21 : i32
    %64 = arith.index_cast %63 : i32 to index
    %c0_22 = arith.constant 0 : index
    %c0_23 = arith.constant 0 : index
    %65 = vector.load %arg17[%64, %c0_22, %c0_23] : memref<8x8x128xf32, #tpu.memory_space<vmem>>, vector<1x8x128xf32>
    %66 = vector.shape_cast %65 : vector<1x8x128xf32> to vector<8x128xf32>
    %67 = vector.shape_cast %61 : vector<8x128xf32> to vector<1x8x128xf32>
    tpu.vector_store %arg17[%64, %c0_22, %c0_23], %67 {strides = array<i32>} : memref<8x8x128xf32, #tpu.memory_space<vmem>>, vector<1x8x128xf32>,
    %68 = vector.extract_strided_slice %9 {offsets = [8, 0], sizes = [8, 512], strides = [1, 1]} : vector<64x512xf32> to vector<8x512xf32>
    %69 = arith.truncf %54 : vector<8x128xf32> to vector<8x128xbf16>
    %cst_24 = arith.constant dense<0.000000e+00> : vector<8x512xf32>
    %70 = tpu.matmul %69, %10, %cst_24 {dimension_numbers = #tpu.dot_dimension_numbers<[1], [0], [0], [1], [0, 0, 1, 1], [], []>} : vector<8x128xbf16>, vector<128x512xbf16>, vector<8x512xf32> -> vector<8x512xf32>
    %71 = arith.addf %68, %70 : vector<8x512xf32>
    %72 = vector.extract_strided_slice %71 {offsets = [0, 0], sizes = [8, 128], strides = [1, 1]} : vector<8x512xf32> to vector<8x128xf32>
    %73 = arith.negf %72 : vector<8x128xf32>
    %74 = math.exp %73 : vector<8x128xf32>
    %cst_25 = arith.constant 1.000000e+00 : f32
    %75 = vector.broadcast %cst_25 : f32 to vector<8x128xf32>
    %76 = arith.addf %75, %74 : vector<8x128xf32>
    %77 = arith.divf %75, %76 : vector<8x128xf32>
    %78 = vector.extract_strided_slice %71 {offsets = [0, 128], sizes = [8, 128], strides = [1, 1]} : vector<8x512xf32> to vector<8x128xf32>
    %79 = arith.negf %78 : vector<8x128xf32>
    %80 = math.exp %79 : vector<8x128xf32>
    %cst_26 = arith.constant 1.000000e+00 : f32
    %81 = vector.broadcast %cst_26 : f32 to vector<8x128xf32>
    %82 = arith.addf %81, %80 : vector<8x128xf32>
    %83 = arith.divf %81, %82 : vector<8x128xf32>
    %84 = vector.extract_strided_slice %71 {offsets = [0, 256], sizes = [8, 128], strides = [1, 1]} : vector<8x512xf32> to vector<8x128xf32>
    %85 = math.tanh %84 : vector<8x128xf32>
    %86 = vector.extract_strided_slice %71 {offsets = [0, 384], sizes = [8, 128], strides = [1, 1]} : vector<8x512xf32> to vector<8x128xf32>
    %87 = arith.negf %86 : vector<8x128xf32>
    %88 = math.exp %87 : vector<8x128xf32>
    %cst_27 = arith.constant 1.000000e+00 : f32
    %89 = vector.broadcast %cst_27 : f32 to vector<8x128xf32>
    %90 = arith.addf %89, %88 : vector<8x128xf32>
    %91 = arith.divf %89, %90 : vector<8x128xf32>
    %92 = arith.mulf %83, %57 : vector<8x128xf32>
    %93 = arith.mulf %77, %85 : vector<8x128xf32>
    %94 = arith.addf %92, %93 : vector<8x128xf32>
    %95 = math.tanh %94 : vector<8x128xf32>
    %96 = arith.mulf %91, %95 : vector<8x128xf32>
    %97 = vector.extract_strided_slice %20 {offsets = [1, 0, 0], sizes = [1, 8, 1], strides = [1, 1, 1]} : vector<8x8x1xi1> to vector<1x8x1xi1>
    %98 = vector.shape_cast %97 : vector<1x8x1xi1> to vector<8x1xi1>
    %99 = vector.shape_cast %98 : vector<8x1xi1> to vector<8x1xi1>
    %100 = vector.broadcast %99 : vector<8x1xi1> to vector<8x128xi1>
    %101 = arith.select %100, %96, %54 : vector<8x128xi1>, vector<8x128xf32>
    %102 = vector.shape_cast %98 : vector<8x1xi1> to vector<8x1xi1>
    %103 = vector.broadcast %102 : vector<8x1xi1> to vector<8x128xi1>
    %104 = arith.select %103, %94, %57 : vector<8x128xi1>, vector<8x128xf32>
    %cst_28 = arith.constant 0.000000e+00 : f32
    %105 = vector.broadcast %cst_28 : f32 to vector<8x128xf32>
    %106 = vector.shape_cast %98 : vector<8x1xi1> to vector<8x1xi1>
    %107 = vector.broadcast %106 : vector<8x1xi1> to vector<8x128xi1>
    %108 = arith.select %107, %96, %105 : vector<8x128xi1>, vector<8x128xf32>
    %c8_i32_29 = arith.constant 8 : i32
    %109 = arith.muli %arg1, %c8_i32_29 : i32
    %c1_i32 = arith.constant 1 : i32
    %110 = arith.addi %109, %c1_i32 : i32
    %111 = arith.index_cast %110 : i32 to index
    %c0_30 = arith.constant 0 : index
    %c0_31 = arith.constant 0 : index
    %112 = vector.load %arg17[%111, %c0_30, %c0_31] : memref<8x8x128xf32, #tpu.memory_space<vmem>>, vector<1x8x128xf32>
    %113 = vector.shape_cast %112 : vector<1x8x128xf32> to vector<8x128xf32>
    %114 = vector.shape_cast %108 : vector<8x128xf32> to vector<1x8x128xf32>
    tpu.vector_store %arg17[%111, %c0_30, %c0_31], %114 {strides = array<i32>} : memref<8x8x128xf32, #tpu.memory_space<vmem>>, vector<1x8x128xf32>,
    %115 = vector.extract_strided_slice %9 {offsets = [16, 0], sizes = [8, 512], strides = [1, 1]} : vector<64x512xf32> to vector<8x512xf32>
    %116 = arith.truncf %101 : vector<8x128xf32> to vector<8x128xbf16>
    %cst_32 = arith.constant dense<0.000000e+00> : vector<8x512xf32>
    %117 = tpu.matmul %116, %10, %cst_32 {dimension_numbers = #tpu.dot_dimension_numbers<[1], [0], [0], [1], [0, 0, 1, 1], [], []>} : vector<8x128xbf16>, vector<128x512xbf16>, vector<8x512xf32> -> vector<8x512xf32>
    %118 = arith.addf %115, %117 : vector<8x512xf32>
    %119 = vector.extract_strided_slice %118 {offsets = [0, 0], sizes = [8, 128], strides = [1, 1]} : vector<8x512xf32> to vector<8x128xf32>
    %120 = arith.negf %119 : vector<8x128xf32>
    %121 = math.exp %120 : vector<8x128xf32>
    %cst_33 = arith.constant 1.000000e+00 : f32
    %122 = vector.broadcast %cst_33 : f32 to vector<8x128xf32>
    %123 = arith.addf %122, %121 : vector<8x128xf32>
    %124 = arith.divf %122, %123 : vector<8x128xf32>
    %125 = vector.extract_strided_slice %118 {offsets = [0, 128], sizes = [8, 128], strides = [1, 1]} : vector<8x512xf32> to vector<8x128xf32>
    %126 = arith.negf %125 : vector<8x128xf32>
    %127 = math.exp %126 : vector<8x128xf32>
    %cst_34 = arith.constant 1.000000e+00 : f32
    %128 = vector.broadcast %cst_34 : f32 to vector<8x128xf32>
    %129 = arith.addf %128, %127 : vector<8x128xf32>
    %130 = arith.divf %128, %129 : vector<8x128xf32>
    %131 = vector.extract_strided_slice %118 {offsets = [0, 256], sizes = [8, 128], strides = [1, 1]} : vector<8x512xf32> to vector<8x128xf32>
    %132 = math.tanh %131 : vector<8x128xf32>
    %133 = vector.extract_strided_slice %118 {offsets = [0, 384], sizes = [8, 128], strides = [1, 1]} : vector<8x512xf32> to vector<8x128xf32>
    %134 = arith.negf %133 : vector<8x128xf32>
    %135 = math.exp %134 : vector<8x128xf32>
    %cst_35 = arith.constant 1.000000e+00 : f32
    %136 = vector.broadcast %cst_35 : f32 to vector<8x128xf32>
    %137 = arith.addf %136, %135 : vector<8x128xf32>
    %138 = arith.divf %136, %137 : vector<8x128xf32>
    %139 = arith.mulf %130, %104 : vector<8x128xf32>
    %140 = arith.mulf %124, %132 : vector<8x128xf32>
    %141 = arith.addf %139, %140 : vector<8x128xf32>
    %142 = math.tanh %141 : vector<8x128xf32>
    %143 = arith.mulf %138, %142 : vector<8x128xf32>
    %144 = vector.extract_strided_slice %20 {offsets = [2, 0, 0], sizes = [1, 8, 1], strides = [1, 1, 1]} : vector<8x8x1xi1> to vector<1x8x1xi1>
    %145 = vector.shape_cast %144 : vector<1x8x1xi1> to vector<8x1xi1>
    %146 = vector.shape_cast %145 : vector<8x1xi1> to vector<8x1xi1>
    %147 = vector.broadcast %146 : vector<8x1xi1> to vector<8x128xi1>
    %148 = arith.select %147, %143, %101 : vector<8x128xi1>, vector<8x128xf32>
    %149 = vector.shape_cast %145 : vector<8x1xi1> to vector<8x1xi1>
    %150 = vector.broadcast %149 : vector<8x1xi1> to vector<8x128xi1>
    %151 = arith.select %150, %141, %104 : vector<8x128xi1>, vector<8x128xf32>
    %cst_36 = arith.constant 0.000000e+00 : f32
    %152 = vector.broadcast %cst_36 : f32 to vector<8x128xf32>
    %153 = vector.shape_cast %145 : vector<8x1xi1> to vector<8x1xi1>
    %154 = vector.broadcast %153 : vector<8x1xi1> to vector<8x128xi1>
    %155 = arith.select %154, %143, %152 : vector<8x128xi1>, vector<8x128xf32>
    %c8_i32_37 = arith.constant 8 : i32
    %156 = arith.muli %arg1, %c8_i32_37 : i32
    %c2_i32 = arith.constant 2 : i32
    %157 = arith.addi %156, %c2_i32 : i32
    %158 = arith.index_cast %157 : i32 to index
    %c0_38 = arith.constant 0 : index
    %c0_39 = arith.constant 0 : index
    %159 = vector.load %arg17[%158, %c0_38, %c0_39] : memref<8x8x128xf32, #tpu.memory_space<vmem>>, vector<1x8x128xf32>
    %160 = vector.shape_cast %159 : vector<1x8x128xf32> to vector<8x128xf32>
    %161 = vector.shape_cast %155 : vector<8x128xf32> to vector<1x8x128xf32>
    tpu.vector_store %arg17[%158, %c0_38, %c0_39], %161 {strides = array<i32>} : memref<8x8x128xf32, #tpu.memory_space<vmem>>, vector<1x8x128xf32>,
    %162 = vector.extract_strided_slice %9 {offsets = [24, 0], sizes = [8, 512], strides = [1, 1]} : vector<64x512xf32> to vector<8x512xf32>
    %163 = arith.truncf %148 : vector<8x128xf32> to vector<8x128xbf16>
    %cst_40 = arith.constant dense<0.000000e+00> : vector<8x512xf32>
    %164 = tpu.matmul %163, %10, %cst_40 {dimension_numbers = #tpu.dot_dimension_numbers<[1], [0], [0], [1], [0, 0, 1, 1], [], []>} : vector<8x128xbf16>, vector<128x512xbf16>, vector<8x512xf32> -> vector<8x512xf32>
    %165 = arith.addf %162, %164 : vector<8x512xf32>
    %166 = vector.extract_strided_slice %165 {offsets = [0, 0], sizes = [8, 128], strides = [1, 1]} : vector<8x512xf32> to vector<8x128xf32>
    %167 = arith.negf %166 : vector<8x128xf32>
    %168 = math.exp %167 : vector<8x128xf32>
    %cst_41 = arith.constant 1.000000e+00 : f32
    %169 = vector.broadcast %cst_41 : f32 to vector<8x128xf32>
    %170 = arith.addf %169, %168 : vector<8x128xf32>
    %171 = arith.divf %169, %170 : vector<8x128xf32>
    %172 = vector.extract_strided_slice %165 {offsets = [0, 128], sizes = [8, 128], strides = [1, 1]} : vector<8x512xf32> to vector<8x128xf32>
    %173 = arith.negf %172 : vector<8x128xf32>
    %174 = math.exp %173 : vector<8x128xf32>
    %cst_42 = arith.constant 1.000000e+00 : f32
    %175 = vector.broadcast %cst_42 : f32 to vector<8x128xf32>
    %176 = arith.addf %175, %174 : vector<8x128xf32>
    %177 = arith.divf %175, %176 : vector<8x128xf32>
    %178 = vector.extract_strided_slice %165 {offsets = [0, 256], sizes = [8, 128], strides = [1, 1]} : vector<8x512xf32> to vector<8x128xf32>
    %179 = math.tanh %178 : vector<8x128xf32>
    %180 = vector.extract_strided_slice %165 {offsets = [0, 384], sizes = [8, 128], strides = [1, 1]} : vector<8x512xf32> to vector<8x128xf32>
    %181 = arith.negf %180 : vector<8x128xf32>
    %182 = math.exp %181 : vector<8x128xf32>
    %cst_43 = arith.constant 1.000000e+00 : f32
    %183 = vector.broadcast %cst_43 : f32 to vector<8x128xf32>
    %184 = arith.addf %183, %182 : vector<8x128xf32>
    %185 = arith.divf %183, %184 : vector<8x128xf32>
    %186 = arith.mulf %177, %151 : vector<8x128xf32>
    %187 = arith.mulf %171, %179 : vector<8x128xf32>
    %188 = arith.addf %186, %187 : vector<8x128xf32>
    %189 = math.tanh %188 : vector<8x128xf32>
    %190 = arith.mulf %185, %189 : vector<8x128xf32>
    %191 = vector.extract_strided_slice %20 {offsets = [3, 0, 0], sizes = [1, 8, 1], strides = [1, 1, 1]} : vector<8x8x1xi1> to vector<1x8x1xi1>
    %192 = vector.shape_cast %191 : vector<1x8x1xi1> to vector<8x1xi1>
    %193 = vector.shape_cast %192 : vector<8x1xi1> to vector<8x1xi1>
    %194 = vector.broadcast %193 : vector<8x1xi1> to vector<8x128xi1>
    %195 = arith.select %194, %190, %148 : vector<8x128xi1>, vector<8x128xf32>
    %196 = vector.shape_cast %192 : vector<8x1xi1> to vector<8x1xi1>
    %197 = vector.broadcast %196 : vector<8x1xi1> to vector<8x128xi1>
    %198 = arith.select %197, %188, %151 : vector<8x128xi1>, vector<8x128xf32>
    %cst_44 = arith.constant 0.000000e+00 : f32
    %199 = vector.broadcast %cst_44 : f32 to vector<8x128xf32>
    %200 = vector.shape_cast %192 : vector<8x1xi1> to vector<8x1xi1>
    %201 = vector.broadcast %200 : vector<8x1xi1> to vector<8x128xi1>
    %202 = arith.select %201, %190, %199 : vector<8x128xi1>, vector<8x128xf32>
    %c8_i32_45 = arith.constant 8 : i32
    %203 = arith.muli %arg1, %c8_i32_45 : i32
    %c3_i32 = arith.constant 3 : i32
    %204 = arith.addi %203, %c3_i32 : i32
    %205 = arith.index_cast %204 : i32 to index
    %c0_46 = arith.constant 0 : index
    %c0_47 = arith.constant 0 : index
    %206 = vector.load %arg17[%205, %c0_46, %c0_47] : memref<8x8x128xf32, #tpu.memory_space<vmem>>, vector<1x8x128xf32>
    %207 = vector.shape_cast %206 : vector<1x8x128xf32> to vector<8x128xf32>
    %208 = vector.shape_cast %202 : vector<8x128xf32> to vector<1x8x128xf32>
    tpu.vector_store %arg17[%205, %c0_46, %c0_47], %208 {strides = array<i32>} : memref<8x8x128xf32, #tpu.memory_space<vmem>>, vector<1x8x128xf32>,
    %209 = vector.extract_strided_slice %9 {offsets = [32, 0], sizes = [8, 512], strides = [1, 1]} : vector<64x512xf32> to vector<8x512xf32>
    %210 = arith.truncf %195 : vector<8x128xf32> to vector<8x128xbf16>
    %cst_48 = arith.constant dense<0.000000e+00> : vector<8x512xf32>
    %211 = tpu.matmul %210, %10, %cst_48 {dimension_numbers = #tpu.dot_dimension_numbers<[1], [0], [0], [1], [0, 0, 1, 1], [], []>} : vector<8x128xbf16>, vector<128x512xbf16>, vector<8x512xf32> -> vector<8x512xf32>
    %212 = arith.addf %209, %211 : vector<8x512xf32>
    %213 = vector.extract_strided_slice %212 {offsets = [0, 0], sizes = [8, 128], strides = [1, 1]} : vector<8x512xf32> to vector<8x128xf32>
    %214 = arith.negf %213 : vector<8x128xf32>
    %215 = math.exp %214 : vector<8x128xf32>
    %cst_49 = arith.constant 1.000000e+00 : f32
    %216 = vector.broadcast %cst_49 : f32 to vector<8x128xf32>
    %217 = arith.addf %216, %215 : vector<8x128xf32>
    %218 = arith.divf %216, %217 : vector<8x128xf32>
    %219 = vector.extract_strided_slice %212 {offsets = [0, 128], sizes = [8, 128], strides = [1, 1]} : vector<8x512xf32> to vector<8x128xf32>
    %220 = arith.negf %219 : vector<8x128xf32>
    %221 = math.exp %220 : vector<8x128xf32>
    %cst_50 = arith.constant 1.000000e+00 : f32
    %222 = vector.broadcast %cst_50 : f32 to vector<8x128xf32>
    %223 = arith.addf %222, %221 : vector<8x128xf32>
    %224 = arith.divf %222, %223 : vector<8x128xf32>
    %225 = vector.extract_strided_slice %212 {offsets = [0, 256], sizes = [8, 128], strides = [1, 1]} : vector<8x512xf32> to vector<8x128xf32>
    %226 = math.tanh %225 : vector<8x128xf32>
    %227 = vector.extract_strided_slice %212 {offsets = [0, 384], sizes = [8, 128], strides = [1, 1]} : vector<8x512xf32> to vector<8x128xf32>
    %228 = arith.negf %227 : vector<8x128xf32>
    %229 = math.exp %228 : vector<8x128xf32>
    %cst_51 = arith.constant 1.000000e+00 : f32
    %230 = vector.broadcast %cst_51 : f32 to vector<8x128xf32>
    %231 = arith.addf %230, %229 : vector<8x128xf32>
    %232 = arith.divf %230, %231 : vector<8x128xf32>
    %233 = arith.mulf %224, %198 : vector<8x128xf32>
    %234 = arith.mulf %218, %226 : vector<8x128xf32>
    %235 = arith.addf %233, %234 : vector<8x128xf32>
    %236 = math.tanh %235 : vector<8x128xf32>
    %237 = arith.mulf %232, %236 : vector<8x128xf32>
    %238 = vector.extract_strided_slice %20 {offsets = [4, 0, 0], sizes = [1, 8, 1], strides = [1, 1, 1]} : vector<8x8x1xi1> to vector<1x8x1xi1>
    %239 = vector.shape_cast %238 : vector<1x8x1xi1> to vector<8x1xi1>
    %240 = vector.shape_cast %239 : vector<8x1xi1> to vector<8x1xi1>
    %241 = vector.broadcast %240 : vector<8x1xi1> to vector<8x128xi1>
    %242 = arith.select %241, %237, %195 : vector<8x128xi1>, vector<8x128xf32>
    %243 = vector.shape_cast %239 : vector<8x1xi1> to vector<8x1xi1>
    %244 = vector.broadcast %243 : vector<8x1xi1> to vector<8x128xi1>
    %245 = arith.select %244, %235, %198 : vector<8x128xi1>, vector<8x128xf32>
    %cst_52 = arith.constant 0.000000e+00 : f32
    %246 = vector.broadcast %cst_52 : f32 to vector<8x128xf32>
    %247 = vector.shape_cast %239 : vector<8x1xi1> to vector<8x1xi1>
    %248 = vector.broadcast %247 : vector<8x1xi1> to vector<8x128xi1>
    %249 = arith.select %248, %237, %246 : vector<8x128xi1>, vector<8x128xf32>
    %c8_i32_53 = arith.constant 8 : i32
    %250 = arith.muli %arg1, %c8_i32_53 : i32
    %c4_i32 = arith.constant 4 : i32
    %251 = arith.addi %250, %c4_i32 : i32
    %252 = arith.index_cast %251 : i32 to index
    %c0_54 = arith.constant 0 : index
    %c0_55 = arith.constant 0 : index
    %253 = vector.load %arg17[%252, %c0_54, %c0_55] : memref<8x8x128xf32, #tpu.memory_space<vmem>>, vector<1x8x128xf32>
    %254 = vector.shape_cast %253 : vector<1x8x128xf32> to vector<8x128xf32>
    %255 = vector.shape_cast %249 : vector<8x128xf32> to vector<1x8x128xf32>
    tpu.vector_store %arg17[%252, %c0_54, %c0_55], %255 {strides = array<i32>} : memref<8x8x128xf32, #tpu.memory_space<vmem>>, vector<1x8x128xf32>,
    %256 = vector.extract_strided_slice %9 {offsets = [40, 0], sizes = [8, 512], strides = [1, 1]} : vector<64x512xf32> to vector<8x512xf32>
    %257 = arith.truncf %242 : vector<8x128xf32> to vector<8x128xbf16>
    %cst_56 = arith.constant dense<0.000000e+00> : vector<8x512xf32>
    %258 = tpu.matmul %257, %10, %cst_56 {dimension_numbers = #tpu.dot_dimension_numbers<[1], [0], [0], [1], [0, 0, 1, 1], [], []>} : vector<8x128xbf16>, vector<128x512xbf16>, vector<8x512xf32> -> vector<8x512xf32>
    %259 = arith.addf %256, %258 : vector<8x512xf32>
    %260 = vector.extract_strided_slice %259 {offsets = [0, 0], sizes = [8, 128], strides = [1, 1]} : vector<8x512xf32> to vector<8x128xf32>
    %261 = arith.negf %260 : vector<8x128xf32>
    %262 = math.exp %261 : vector<8x128xf32>
    %cst_57 = arith.constant 1.000000e+00 : f32
    %263 = vector.broadcast %cst_57 : f32 to vector<8x128xf32>
    %264 = arith.addf %263, %262 : vector<8x128xf32>
    %265 = arith.divf %263, %264 : vector<8x128xf32>
    %266 = vector.extract_strided_slice %259 {offsets = [0, 128], sizes = [8, 128], strides = [1, 1]} : vector<8x512xf32> to vector<8x128xf32>
    %267 = arith.negf %266 : vector<8x128xf32>
    %268 = math.exp %267 : vector<8x128xf32>
    %cst_58 = arith.constant 1.000000e+00 : f32
    %269 = vector.broadcast %cst_58 : f32 to vector<8x128xf32>
    %270 = arith.addf %269, %268 : vector<8x128xf32>
    %271 = arith.divf %269, %270 : vector<8x128xf32>
    %272 = vector.extract_strided_slice %259 {offsets = [0, 256], sizes = [8, 128], strides = [1, 1]} : vector<8x512xf32> to vector<8x128xf32>
    %273 = math.tanh %272 : vector<8x128xf32>
    %274 = vector.extract_strided_slice %259 {offsets = [0, 384], sizes = [8, 128], strides = [1, 1]} : vector<8x512xf32> to vector<8x128xf32>
    %275 = arith.negf %274 : vector<8x128xf32>
    %276 = math.exp %275 : vector<8x128xf32>
    %cst_59 = arith.constant 1.000000e+00 : f32
    %277 = vector.broadcast %cst_59 : f32 to vector<8x128xf32>
    %278 = arith.addf %277, %276 : vector<8x128xf32>
    %279 = arith.divf %277, %278 : vector<8x128xf32>
    %280 = arith.mulf %271, %245 : vector<8x128xf32>
    %281 = arith.mulf %265, %273 : vector<8x128xf32>
    %282 = arith.addf %280, %281 : vector<8x128xf32>
    %283 = math.tanh %282 : vector<8x128xf32>
    %284 = arith.mulf %279, %283 : vector<8x128xf32>
    %285 = vector.extract_strided_slice %20 {offsets = [5, 0, 0], sizes = [1, 8, 1], strides = [1, 1, 1]} : vector<8x8x1xi1> to vector<1x8x1xi1>
    %286 = vector.shape_cast %285 : vector<1x8x1xi1> to vector<8x1xi1>
    %287 = vector.shape_cast %286 : vector<8x1xi1> to vector<8x1xi1>
    %288 = vector.broadcast %287 : vector<8x1xi1> to vector<8x128xi1>
    %289 = arith.select %288, %284, %242 : vector<8x128xi1>, vector<8x128xf32>
    %290 = vector.shape_cast %286 : vector<8x1xi1> to vector<8x1xi1>
    %291 = vector.broadcast %290 : vector<8x1xi1> to vector<8x128xi1>
    %292 = arith.select %291, %282, %245 : vector<8x128xi1>, vector<8x128xf32>
    %cst_60 = arith.constant 0.000000e+00 : f32
    %293 = vector.broadcast %cst_60 : f32 to vector<8x128xf32>
    %294 = vector.shape_cast %286 : vector<8x1xi1> to vector<8x1xi1>
    %295 = vector.broadcast %294 : vector<8x1xi1> to vector<8x128xi1>
    %296 = arith.select %295, %284, %293 : vector<8x128xi1>, vector<8x128xf32>
    %c8_i32_61 = arith.constant 8 : i32
    %297 = arith.muli %arg1, %c8_i32_61 : i32
    %c5_i32 = arith.constant 5 : i32
    %298 = arith.addi %297, %c5_i32 : i32
    %299 = arith.index_cast %298 : i32 to index
    %c0_62 = arith.constant 0 : index
    %c0_63 = arith.constant 0 : index
    %300 = vector.load %arg17[%299, %c0_62, %c0_63] : memref<8x8x128xf32, #tpu.memory_space<vmem>>, vector<1x8x128xf32>
    %301 = vector.shape_cast %300 : vector<1x8x128xf32> to vector<8x128xf32>
    %302 = vector.shape_cast %296 : vector<8x128xf32> to vector<1x8x128xf32>
    tpu.vector_store %arg17[%299, %c0_62, %c0_63], %302 {strides = array<i32>} : memref<8x8x128xf32, #tpu.memory_space<vmem>>, vector<1x8x128xf32>,
    %303 = vector.extract_strided_slice %9 {offsets = [48, 0], sizes = [8, 512], strides = [1, 1]} : vector<64x512xf32> to vector<8x512xf32>
    %304 = arith.truncf %289 : vector<8x128xf32> to vector<8x128xbf16>
    %cst_64 = arith.constant dense<0.000000e+00> : vector<8x512xf32>
    %305 = tpu.matmul %304, %10, %cst_64 {dimension_numbers = #tpu.dot_dimension_numbers<[1], [0], [0], [1], [0, 0, 1, 1], [], []>} : vector<8x128xbf16>, vector<128x512xbf16>, vector<8x512xf32> -> vector<8x512xf32>
    %306 = arith.addf %303, %305 : vector<8x512xf32>
    %307 = vector.extract_strided_slice %306 {offsets = [0, 0], sizes = [8, 128], strides = [1, 1]} : vector<8x512xf32> to vector<8x128xf32>
    %308 = arith.negf %307 : vector<8x128xf32>
    %309 = math.exp %308 : vector<8x128xf32>
    %cst_65 = arith.constant 1.000000e+00 : f32
    %310 = vector.broadcast %cst_65 : f32 to vector<8x128xf32>
    %311 = arith.addf %310, %309 : vector<8x128xf32>
    %312 = arith.divf %310, %311 : vector<8x128xf32>
    %313 = vector.extract_strided_slice %306 {offsets = [0, 128], sizes = [8, 128], strides = [1, 1]} : vector<8x512xf32> to vector<8x128xf32>
    %314 = arith.negf %313 : vector<8x128xf32>
    %315 = math.exp %314 : vector<8x128xf32>
    %cst_66 = arith.constant 1.000000e+00 : f32
    %316 = vector.broadcast %cst_66 : f32 to vector<8x128xf32>
    %317 = arith.addf %316, %315 : vector<8x128xf32>
    %318 = arith.divf %316, %317 : vector<8x128xf32>
    %319 = vector.extract_strided_slice %306 {offsets = [0, 256], sizes = [8, 128], strides = [1, 1]} : vector<8x512xf32> to vector<8x128xf32>
    %320 = math.tanh %319 : vector<8x128xf32>
    %321 = vector.extract_strided_slice %306 {offsets = [0, 384], sizes = [8, 128], strides = [1, 1]} : vector<8x512xf32> to vector<8x128xf32>
    %322 = arith.negf %321 : vector<8x128xf32>
    %323 = math.exp %322 : vector<8x128xf32>
    %cst_67 = arith.constant 1.000000e+00 : f32
    %324 = vector.broadcast %cst_67 : f32 to vector<8x128xf32>
    %325 = arith.addf %324, %323 : vector<8x128xf32>
    %326 = arith.divf %324, %325 : vector<8x128xf32>
    %327 = arith.mulf %318, %292 : vector<8x128xf32>
    %328 = arith.mulf %312, %320 : vector<8x128xf32>
    %329 = arith.addf %327, %328 : vector<8x128xf32>
    %330 = math.tanh %329 : vector<8x128xf32>
    %331 = arith.mulf %326, %330 : vector<8x128xf32>
    %332 = vector.extract_strided_slice %20 {offsets = [6, 0, 0], sizes = [1, 8, 1], strides = [1, 1, 1]} : vector<8x8x1xi1> to vector<1x8x1xi1>
    %333 = vector.shape_cast %332 : vector<1x8x1xi1> to vector<8x1xi1>
    %334 = vector.shape_cast %333 : vector<8x1xi1> to vector<8x1xi1>
    %335 = vector.broadcast %334 : vector<8x1xi1> to vector<8x128xi1>
    %336 = arith.select %335, %331, %289 : vector<8x128xi1>, vector<8x128xf32>
    %337 = vector.shape_cast %333 : vector<8x1xi1> to vector<8x1xi1>
    %338 = vector.broadcast %337 : vector<8x1xi1> to vector<8x128xi1>
    %339 = arith.select %338, %329, %292 : vector<8x128xi1>, vector<8x128xf32>
    %cst_68 = arith.constant 0.000000e+00 : f32
    %340 = vector.broadcast %cst_68 : f32 to vector<8x128xf32>
    %341 = vector.shape_cast %333 : vector<8x1xi1> to vector<8x1xi1>
    %342 = vector.broadcast %341 : vector<8x1xi1> to vector<8x128xi1>
    %343 = arith.select %342, %331, %340 : vector<8x128xi1>, vector<8x128xf32>
    %c8_i32_69 = arith.constant 8 : i32
    %344 = arith.muli %arg1, %c8_i32_69 : i32
    %c6_i32 = arith.constant 6 : i32
    %345 = arith.addi %344, %c6_i32 : i32
    %346 = arith.index_cast %345 : i32 to index
    %c0_70 = arith.constant 0 : index
    %c0_71 = arith.constant 0 : index
    %347 = vector.load %arg17[%346, %c0_70, %c0_71] : memref<8x8x128xf32, #tpu.memory_space<vmem>>, vector<1x8x128xf32>
    %348 = vector.shape_cast %347 : vector<1x8x128xf32> to vector<8x128xf32>
    %349 = vector.shape_cast %343 : vector<8x128xf32> to vector<1x8x128xf32>
    tpu.vector_store %arg17[%346, %c0_70, %c0_71], %349 {strides = array<i32>} : memref<8x8x128xf32, #tpu.memory_space<vmem>>, vector<1x8x128xf32>,
    %350 = vector.extract_strided_slice %9 {offsets = [56, 0], sizes = [8, 512], strides = [1, 1]} : vector<64x512xf32> to vector<8x512xf32>
    %351 = arith.truncf %336 : vector<8x128xf32> to vector<8x128xbf16>
    %cst_72 = arith.constant dense<0.000000e+00> : vector<8x512xf32>
    %352 = tpu.matmul %351, %10, %cst_72 {dimension_numbers = #tpu.dot_dimension_numbers<[1], [0], [0], [1], [0, 0, 1, 1], [], []>} : vector<8x128xbf16>, vector<128x512xbf16>, vector<8x512xf32> -> vector<8x512xf32>
    %353 = arith.addf %350, %352 : vector<8x512xf32>
    %354 = vector.extract_strided_slice %353 {offsets = [0, 0], sizes = [8, 128], strides = [1, 1]} : vector<8x512xf32> to vector<8x128xf32>
    %355 = arith.negf %354 : vector<8x128xf32>
    %356 = math.exp %355 : vector<8x128xf32>
    %cst_73 = arith.constant 1.000000e+00 : f32
    %357 = vector.broadcast %cst_73 : f32 to vector<8x128xf32>
    %358 = arith.addf %357, %356 : vector<8x128xf32>
    %359 = arith.divf %357, %358 : vector<8x128xf32>
    %360 = vector.extract_strided_slice %353 {offsets = [0, 128], sizes = [8, 128], strides = [1, 1]} : vector<8x512xf32> to vector<8x128xf32>
    %361 = arith.negf %360 : vector<8x128xf32>
    %362 = math.exp %361 : vector<8x128xf32>
    %cst_74 = arith.constant 1.000000e+00 : f32
    %363 = vector.broadcast %cst_74 : f32 to vector<8x128xf32>
    %364 = arith.addf %363, %362 : vector<8x128xf32>
    %365 = arith.divf %363, %364 : vector<8x128xf32>
    %366 = vector.extract_strided_slice %353 {offsets = [0, 256], sizes = [8, 128], strides = [1, 1]} : vector<8x512xf32> to vector<8x128xf32>
    %367 = math.tanh %366 : vector<8x128xf32>
    %368 = vector.extract_strided_slice %353 {offsets = [0, 384], sizes = [8, 128], strides = [1, 1]} : vector<8x512xf32> to vector<8x128xf32>
    %369 = arith.negf %368 : vector<8x128xf32>
    %370 = math.exp %369 : vector<8x128xf32>
    %cst_75 = arith.constant 1.000000e+00 : f32
    %371 = vector.broadcast %cst_75 : f32 to vector<8x128xf32>
    %372 = arith.addf %371, %370 : vector<8x128xf32>
    %373 = arith.divf %371, %372 : vector<8x128xf32>
    %374 = arith.mulf %365, %339 : vector<8x128xf32>
    %375 = arith.mulf %359, %367 : vector<8x128xf32>
    %376 = arith.addf %374, %375 : vector<8x128xf32>
    %377 = math.tanh %376 : vector<8x128xf32>
    %378 = arith.mulf %373, %377 : vector<8x128xf32>
    %379 = vector.extract_strided_slice %20 {offsets = [7, 0, 0], sizes = [1, 8, 1], strides = [1, 1, 1]} : vector<8x8x1xi1> to vector<1x8x1xi1>
    %380 = vector.shape_cast %379 : vector<1x8x1xi1> to vector<8x1xi1>
    %381 = vector.shape_cast %380 : vector<8x1xi1> to vector<8x1xi1>
    %382 = vector.broadcast %381 : vector<8x1xi1> to vector<8x128xi1>
    %383 = arith.select %382, %378, %336 : vector<8x128xi1>, vector<8x128xf32>
    %384 = vector.shape_cast %380 : vector<8x1xi1> to vector<8x1xi1>
    %385 = vector.broadcast %384 : vector<8x1xi1> to vector<8x128xi1>
    %386 = arith.select %385, %376, %339 : vector<8x128xi1>, vector<8x128xf32>
    %cst_76 = arith.constant 0.000000e+00 : f32
    %387 = vector.broadcast %cst_76 : f32 to vector<8x128xf32>
    %388 = vector.shape_cast %380 : vector<8x1xi1> to vector<8x1xi1>
    %389 = vector.broadcast %388 : vector<8x1xi1> to vector<8x128xi1>
    %390 = arith.select %389, %378, %387 : vector<8x128xi1>, vector<8x128xf32>
    %c8_i32_77 = arith.constant 8 : i32
    %391 = arith.muli %arg1, %c8_i32_77 : i32
    %c7_i32 = arith.constant 7 : i32
    %392 = arith.addi %391, %c7_i32 : i32
    %393 = arith.index_cast %392 : i32 to index
    %c0_78 = arith.constant 0 : index
    %c0_79 = arith.constant 0 : index
    %394 = vector.load %arg17[%393, %c0_78, %c0_79] : memref<8x8x128xf32, #tpu.memory_space<vmem>>, vector<1x8x128xf32>
    %395 = vector.shape_cast %394 : vector<1x8x128xf32> to vector<8x128xf32>
    %396 = vector.shape_cast %390 : vector<8x128xf32> to vector<1x8x128xf32>
    tpu.vector_store %arg17[%393, %c0_78, %c0_79], %396 {strides = array<i32>} : memref<8x8x128xf32, #tpu.memory_space<vmem>>, vector<1x8x128xf32>,
    %c0_80 = arith.constant 0 : index
    %c0_81 = arith.constant 0 : index
    %397 = vector.load %arg15[%c0_80, %c0_81] : memref<8x128xf32, #tpu.memory_space<vmem>>, vector<8x128xf32>
    tpu.vector_store %arg15[%c0_80, %c0_81], %383 {strides = array<i32>} : memref<8x128xf32, #tpu.memory_space<vmem>>, vector<8x128xf32>,
    %c0_82 = arith.constant 0 : index
    %c0_83 = arith.constant 0 : index
    %398 = vector.load %arg16[%c0_82, %c0_83] : memref<8x128xf32, #tpu.memory_space<vmem>>, vector<8x128xf32>
    tpu.vector_store %arg16[%c0_82, %c0_83], %386 {strides = array<i32>} : memref<8x128xf32, #tpu.memory_space<vmem>>, vector<8x128xf32>,
    %c0_i32_84 = arith.constant 0 : i32
    %399 = arith.cmpi eq, %arg1, %c0_i32_84 : i32
    %400 = arith.extui %399 : i1 to i32
    %c0_i32_85 = arith.constant 0 : i32
    %401 = arith.cmpi ne, %400, %c0_i32_85 : i32
    scf.if %401 {
      %c0_86 = arith.constant 0 : index
      %c0_87 = arith.constant 0 : index
      %c0_88 = arith.constant 0 : index
      %402 = vector.load %arg17[%c0_86, %c0_87, %c0_88] : memref<8x8x128xf32, #tpu.memory_space<vmem>>, vector<8x8x128xf32>
      %403 = arith.truncf %383 : vector<8x128xf32> to vector<8x128xbf16>
      %c0_89 = arith.constant 0 : index
      %c0_90 = arith.constant 0 : index
      %404 = vector.load %arg9[%c0_89, %c0_90] : memref<128x128xbf16, #tpu.memory_space<vmem>>, vector<128x128xbf16>
      %cst_91 = arith.constant dense<0.000000e+00> : vector<8x128xf32>
      %405 = tpu.matmul %403, %404, %cst_91 {dimension_numbers = #tpu.dot_dimension_numbers<[1], [0], [0], [1], [0, 0, 1, 1], [], []>} : vector<8x128xbf16>, vector<128x128xbf16>, vector<8x128xf32> -> vector<8x128xf32>
      %406 = vector.shape_cast %405 : vector<8x128xf32> to vector<1x8x128xf32>
      %407 = vector.broadcast %406 : vector<1x8x128xf32> to vector<8x8x128xf32>
      %408 = arith.mulf %402, %407 : vector<8x8x128xf32>
      %cst_92 = arith.constant dense<0.000000e+00> : vector<8x8xf32>
      %409 = vector.multi_reduction <add>, %408, %cst_92 [2] : vector<8x8x128xf32> to vector<8x8xf32>
      %410 = tpu.transpose %409, [1, 0] : vector<8x8xf32> -> vector<8x8xf32>
      %cst_93 = arith.constant dense<0xFF800000> : vector<8xf32>
      %411 = vector.multi_reduction <maximumf>, %410, %cst_93 [1] : vector<8x8xf32> to vector<8xf32>
      %412 = vector.shape_cast %411 : vector<8xf32> to vector<8x1xf32>
      %413 = vector.broadcast %412 : vector<8x1xf32> to vector<8x8xf32>
      %414 = arith.subf %410, %413 : vector<8x8xf32>
      %415 = math.exp %414 : vector<8x8xf32>
      %cst_94 = arith.constant dense<0.000000e+00> : vector<8xf32>
      %416 = vector.multi_reduction <add>, %415, %cst_94 [1] : vector<8x8xf32> to vector<8xf32>
      %417 = vector.shape_cast %416 : vector<8xf32> to vector<8x1xf32>
      %418 = tpu.reciprocal %417 : vector<8x1xf32> -> vector<8x1xf32>
      %419 = vector.broadcast %418 : vector<8x1xf32> to vector<8x8xf32>
      %420 = arith.mulf %415, %419 : vector<8x8xf32>
      %421 = tpu.transpose %420, [1, 0] : vector<8x8xf32> -> vector<8x8xf32>
      %422 = vector.shape_cast %421 : vector<8x8xf32> to vector<8x8x1xf32>
      %423 = vector.broadcast %422 : vector<8x8x1xf32> to vector<8x8x128xf32>
      %424 = arith.mulf %423, %402 : vector<8x8x128xf32>
      %cst_95 = arith.constant dense<0.000000e+00> : vector<8x128xf32>
      %425 = vector.multi_reduction <add>, %424, %cst_95 [0] : vector<8x8x128xf32> to vector<8x128xf32>
      %426 = arith.truncf %425 : vector<8x128xf32> to vector<8x128xbf16>
      %c0_96 = arith.constant 0 : index
      %c0_97 = arith.constant 0 : index
      %427 = vector.load %arg10[%c0_96, %c0_97] : memref<128x128xbf16, #tpu.memory_space<vmem>>, vector<128x128xbf16>
      %cst_98 = arith.constant dense<0.000000e+00> : vector<8x128xf32>
      %428 = tpu.matmul %426, %427, %cst_98 {dimension_numbers = #tpu.dot_dimension_numbers<[1], [0], [0], [1], [0, 0, 1, 1], [], []>} : vector<8x128xbf16>, vector<128x128xbf16>, vector<8x128xf32> -> vector<8x128xf32>
      %c0_99 = arith.constant 0 : index
      %c0_100 = arith.constant 0 : index
      %429 = vector.load %arg11[%c0_99, %c0_100] : memref<1x128xf32, #tpu.memory_space<vmem>>, vector<1x128xf32>
      %430 = vector.broadcast %429 : vector<1x128xf32> to vector<8x128xf32>
      %431 = arith.addf %428, %430 : vector<8x128xf32>
      %cst_101 = arith.constant dense<0xFF800000> : vector<8xf32>
      %432 = vector.multi_reduction <maximumf>, %431, %cst_101 [1] : vector<8x128xf32> to vector<8xf32>
      %433 = vector.shape_cast %432 : vector<8xf32> to vector<8x1xf32>
      %434 = vector.broadcast %433 : vector<8x1xf32> to vector<8x128xf32>
      %435 = arith.subf %431, %434 : vector<8x128xf32>
      %436 = math.exp %435 : vector<8x128xf32>
      %cst_102 = arith.constant dense<0.000000e+00> : vector<8xf32>
      %437 = vector.multi_reduction <add>, %436, %cst_102 [1] : vector<8x128xf32> to vector<8xf32>
      %438 = vector.shape_cast %437 : vector<8xf32> to vector<8x1xf32>
      %439 = math.log %438 : vector<8x1xf32>
      %440 = arith.addf %439, %433 : vector<8x1xf32>
      %441 = vector.broadcast %440 : vector<8x1xf32> to vector<8x128xf32>
      %442 = arith.subf %431, %441 : vector<8x128xf32>
      %c0_103 = arith.constant 0 : index
      %c0_104 = arith.constant 0 : index
      %443 = vector.load %arg12[%c0_103, %c0_104] : memref<8x128xf32, #tpu.memory_space<vmem>>, vector<8x128xf32>
      tpu.vector_store %arg12[%c0_103, %c0_104], %442 {strides = array<i32>} : memref<8x128xf32, #tpu.memory_space<vmem>>, vector<8x128xf32>,
      %c0_105 = arith.constant 0 : index
      %c0_106 = arith.constant 0 : index
      %444 = vector.load %arg13[%c0_105, %c0_106] : memref<8x128xf32, #tpu.memory_space<vmem>>, vector<8x128xf32>
      tpu.vector_store %arg13[%c0_105, %c0_106], %425 {strides = array<i32>} : memref<8x128xf32, #tpu.memory_space<vmem>>, vector<8x128xf32>,
      %c0_107 = arith.constant 0 : index
      %c0_108 = arith.constant 0 : index
      %445 = vector.load %arg14[%c0_107, %c0_108] : memref<8x8xf32, #tpu.memory_space<vmem>>, vector<8x8xf32>
      tpu.vector_store %arg14[%c0_107, %c0_108], %420 {strides = array<i32>} : memref<8x8xf32, #tpu.memory_space<vmem>>, vector<8x8xf32>,
    } else {
    }
    return
  }
  func.func @transform_0(%arg0: i32, %arg1: i32) -> (i32, i32, i32) {
    %c0_i32 = arith.constant 0 : i32
    %c0_i32_0 = arith.constant 0 : i32
    return %arg1, %arg0, %c0_i32 : i32, i32, i32
  }
  func.func @transform_1(%arg0: i32, %arg1: i32) -> (i32, i32) {
    %c0_i32 = arith.constant 0 : i32
    %c0_i32_0 = arith.constant 0 : i32
    %c0_i32_1 = arith.constant 0 : i32
    return %c0_i32, %c0_i32_0 : i32, i32
  }
  func.func @transform_2(%arg0: i32, %arg1: i32) -> (i32, i32) {
    %c0_i32 = arith.constant 0 : i32
    %c0_i32_0 = arith.constant 0 : i32
    %c0_i32_1 = arith.constant 0 : i32
    return %c0_i32, %c0_i32_0 : i32, i32
  }
  func.func @transform_3(%arg0: i32, %arg1: i32) -> (i32, i32) {
    %c0_i32 = arith.constant 0 : i32
    %c0_i32_0 = arith.constant 0 : i32
    %c0_i32_1 = arith.constant 0 : i32
    return %c0_i32, %c0_i32_0 : i32, i32
  }
  func.func @transform_4(%arg0: i32, %arg1: i32) -> (i32, i32) {
    %c0_i32 = arith.constant 0 : i32
    %c0_i32_0 = arith.constant 0 : i32
    return %arg0, %c0_i32 : i32, i32
  }
  func.func @transform_5(%arg0: i32, %arg1: i32) -> (i32, i32) {
    %c0_i32 = arith.constant 0 : i32
    %c0_i32_0 = arith.constant 0 : i32
    return %arg0, %c0_i32 : i32, i32
  }
  func.func @transform_6(%arg0: i32, %arg1: i32) -> (i32, i32) {
    %c0_i32 = arith.constant 0 : i32
    %c0_i32_0 = arith.constant 0 : i32
    return %arg0, %c0_i32 : i32, i32
  }
  func.func @transform_7(%arg0: i32, %arg1: i32) -> (i32, i32) {
    %c0_i32 = arith.constant 0 : i32
    %c0_i32_0 = arith.constant 0 : i32
    %c0_i32_1 = arith.constant 0 : i32
    return %c0_i32, %c0_i32_0 : i32, i32
  }
  func.func @transform_8(%arg0: i32, %arg1: i32) -> (i32, i32) {
    %c0_i32 = arith.constant 0 : i32
    %c0_i32_0 = arith.constant 0 : i32
    %c0_i32_1 = arith.constant 0 : i32
    return %c0_i32, %c0_i32_0 : i32, i32
  }
  func.func @transform_9(%arg0: i32, %arg1: i32) -> (i32, i32) {
    %c0_i32 = arith.constant 0 : i32
    %c0_i32_0 = arith.constant 0 : i32
    %c0_i32_1 = arith.constant 0 : i32
    return %c0_i32, %c0_i32_0 : i32, i32
  }
  func.func @transform_10(%arg0: i32, %arg1: i32) -> (i32, i32) {
    %c0_i32 = arith.constant 0 : i32
    %c0_i32_0 = arith.constant 0 : i32
    return %arg0, %c0_i32 : i32, i32
  }
  func.func @transform_11(%arg0: i32, %arg1: i32) -> (i32, i32) {
    %c0_i32 = arith.constant 0 : i32
    %c0_i32_0 = arith.constant 0 : i32
    return %arg0, %c0_i32 : i32, i32
  }
  func.func @transform_12(%arg0: i32, %arg1: i32) -> (i32, i32) {
    %c0_i32 = arith.constant 0 : i32
    %c0_i32_0 = arith.constant 0 : i32
    return %arg0, %c0_i32 : i32, i32
  }
}

</mosaic_0001>

<bundles_post_ra>
// kernel: self_attentive_rnn_forward.1
= control target key start
LH: loop header
LB: loop body
LE: loop exit
PB: predicated region body
PF: predicated region fallthrough
CT: control target
= control target key end

     0   :  { %v3726_v1 = vmov 0   ;;  %vm2583_vm15 = vmmov 0   ;;  %s3708_s1 = inlined_call_operand.vmem [shape: bf16[128,512], index: 1, kind: input, shape index: {}]   ;;  %s3709_s0 = inlined_call_operand.vmem [shape: bf16[8,8,128], index: 0, kind: input, shape index: {}]   ;;  %s3710_s2 = inlined_call_operand.vmem [shape: bf16[128,512], index: 2, kind: input, shape index: {}]   ;;  %s3711_s6 = inlined_call_operand.vmem [shape: s32[8,1], index: 6, kind: input, shape index: {}]   ;;  %s3712_s4 = inlined_call_operand.vmem [shape: f32[8,128], index: 4, kind: input, shape index: {}]   ;;  %s3713_s3 = inlined_call_operand.vmem [shape: f32[1,512], index: 3, kind: input, shape index: {}]   ;;  %s3714_s5 = inlined_call_operand.vmem [shape: f32[8,128], index: 5, kind: input, shape index: {}]   ;;  %s3715_s7 = inlined_call_operand.vmem [shape: bf16[128,128], index: 7, kind: input, shape index: {}]   ;;  %s3716_s12 = inlined_call_operand.vmem [shape: f32[8,8], index: 12, kind: output, shape index: {2}]   ;;  %s3717_s8 = inlined_call_operand.vmem [shape: bf16[128,128], index: 8, kind: input, shape index: {}]   ;;  %s3718_s11 = inlined_call_operand.vmem [shape: f32[8,128], index: 11, kind: output, shape index: {1}]   ;;  %s3719_s9 = inlined_call_operand.vmem [shape: f32[1,128], index: 9, kind: input, shape index: {}]   ;;  %s3720_s10 = inlined_call_operand.vmem [shape: f32[8,128], index: 10, kind: output, shape index: {0}]  }
   0x1   :  { %v2297_v0 = vld [vmem:[%s3708_s1 + $0x4] ss:$16 sps:$4 sm:$0xff]   ;;  %325 = vmatprep.mubr.bf16.mxu0 %v3726_v1  ;;  %398 = vmatprep.mubr.bf16.mxu1 %v3726_v1  ;;  %v2299_v2 = vld [vmem:[%s3708_s1 + $0xc] ss:$16 sps:$4 sm:$0xff]   ;;  %v2301_v3 = vld [vmem:[%s3708_s1] ss:$16 sps:$4 sm:$0xff]  }
   0x2   :  { %2295 = vset.pattern.permute.xlu0 %v3726_v1  ;;  %2296 = vset.pattern.permute.xlu1 %v3726_v1  ;;  %v2302_v4 = vld [vmem:[%s3708_s1 + $0x8] ss:$16 sps:$4 sm:$0xff]   ;;  %v2303_v5 = vld [vmem:[%s3708_s1 + $0x24] ss:$16 sps:$4 sm:$0xff]   ;;  %v2305_v6 = vld [vmem:[%s3708_s1 + $0x2c] ss:$16 sps:$4 sm:$0xff]  }
   0x3   :  { %293 = vmatprep.subr.bf16.mxu0 %v2297_v0  ;;  %366 = vmatprep.subr.bf16.mxu1 %v2299_v2  ;;  %v2307_v7 = vld [vmem:[%s3708_s1 + $0x20] ss:$16 sps:$4 sm:$0xff]   ;;  %v2308_v8 = vld [vmem:[%s3708_s1 + $0x28] ss:$16 sps:$4 sm:$0xff]   ;;  %v2309_v9 = vld [vmem:[%s3708_s1 + $0x44] ss:$16 sps:$4 sm:$0xff]  }
   0x4   :  { %294 = vmatpush1.bf16.msra.mxu0 %v2301_v3  ;;  %367 = vmatpush1.bf16.msra.mxu1 %v2302_v4  ;;  %v2311_v10 = vld [vmem:[%s3708_s1 + $0x4c] ss:$16 sps:$4 sm:$0xff]   ;;  %v2313_v11 = vld [vmem:[%s3708_s1 + $0x40] ss:$16 sps:$4 sm:$0xff]   ;;  %v2314_v12 = vld [vmem:[%s3708_s1 + $0x48] ss:$16 sps:$4 sm:$0xff]  }
   0x5   :  { %295 = vmatprep.subr.bf16.mxu0 %v2303_v5  ;;  %368 = vmatprep.subr.bf16.mxu1 %v2305_v6  ;;  %v2315_v13 = vld [vmem:[%s3708_s1 + $0x64] ss:$16 sps:$4 sm:$0xff]   ;;  %v2317_v14 = vld [vmem:[%s3708_s1 + $0x6c] ss:$16 sps:$4 sm:$0xff]   ;;  %v2319_v15 = vld [vmem:[%s3708_s1 + $0x60] ss:$16 sps:$4 sm:$0xff]  }
   0x6   :  { %v2320_v16 = vld [vmem:[%s3708_s1 + $0x68] ss:$16 sps:$4 sm:$0xff]   ;;  %v2321_v17 = vld [vmem:[%s3708_s1 + $0x84] ss:$16 sps:$4 sm:$0xff]   ;;  %v2323_v18 = vld [vmem:[%s3708_s1 + $0x8c] ss:$16 sps:$4 sm:$0xff]  }
   0x7   :  { %v2325_v19 = vld [vmem:[%s3708_s1 + $0x80] ss:$16 sps:$4 sm:$0xff]   ;;  %v2326_v20 = vld [vmem:[%s3708_s1 + $0x88] ss:$16 sps:$4 sm:$0xff]   ;;  %v2327_v21 = vld [vmem:[%s3708_s1 + $0xa4] ss:$16 sps:$4 sm:$0xff]  }
   0x8   :  { %296 = vmatpush1.bf16.msra.mxu0 %v2307_v7  ;;  %369 = vmatpush1.bf16.msra.mxu1 %v2308_v8  ;;  %v2329_v22 = vld [vmem:[%s3708_s1 + $0xac] ss:$16 sps:$4 sm:$0xff]   ;;  %v2331_v23 = vld [vmem:[%s3708_s1 + $0xa0] ss:$16 sps:$4 sm:$0xff]   ;;  %v2332_v24 = vld [vmem:[%s3708_s1 + $0xa8] ss:$16 sps:$4 sm:$0xff]  }
   0x9   :  { %297 = vmatprep.subr.bf16.mxu0 %v2309_v9  ;;  %370 = vmatprep.subr.bf16.mxu1 %v2311_v10  ;;  %v2333_v25 = vld [vmem:[%s3708_s1 + $0xc4] ss:$16 sps:$4 sm:$0xff]   ;;  %v2335_v26 = vld [vmem:[%s3708_s1 + $0xcc] ss:$16 sps:$4 sm:$0xff]   ;;  %v2337_v27 = vld [vmem:[%s3708_s1 + $0xc0] ss:$16 sps:$4 sm:$0xff]  }
   0xa   :  { %v2338_v28 = vld [vmem:[%s3708_s1 + $0xc8] ss:$16 sps:$4 sm:$0xff]   ;;  %v2339_v29 = vld [vmem:[%s3708_s1 + $0xe4] ss:$16 sps:$4 sm:$0xff]   ;;  %v2341_v30 = vld [vmem:[%s3708_s1 + $0xec] ss:$16 sps:$4 sm:$0xff]  }
   0xb   :  { %v2343_v31 = vld [vmem:[%s3708_s1 + $0xe0] ss:$16 sps:$4 sm:$0xff]   ;;  %v2344_v32 = vld [vmem:[%s3708_s1 + $0xe8] ss:$16 sps:$4 sm:$0xff]   ;;  %v2752_v33 = vld [vmem:[%s3710_s2 + $0x4] ss:$16 sps:$4 sm:$0xff]  }
   0xc   :  { %298 = vmatpush1.bf16.msra.mxu0 %v2313_v11  ;;  %371 = vmatpush1.bf16.msra.mxu1 %v2314_v12  ;;  %v2757_v34 = vld [vmem:[%s3710_s2 + $0xc] ss:$16 sps:$4 sm:$0xff]   ;;  %v2345_v35 = vld [vmem:[%s3709_s0] sm:$0xff]   ;;  %v2770_v37 = vld [vmem:[%s3710_s2 + $0x8] ss:$16 sps:$4 sm:$0xff]  }
   0xd   :  { %299 = vmatprep.subr.bf16.mxu0 %v2315_v13  ;;  %372 = vmatprep.subr.bf16.mxu1 %v2317_v14  ;;  %v2765_v36 = vld [vmem:[%s3710_s2] ss:$16 sps:$4 sm:$0xff]   ;;  %v2777_v38 = vld [vmem:[%s3710_s2 + $0x24] ss:$16 sps:$4 sm:$0xff]   ;;  %v2782_v39 = vld [vmem:[%s3710_s2 + $0x2c] ss:$16 sps:$4 sm:$0xff]   ;;  %v3725_v13 = vlaneseq }
   0xe   :  { %v2787_v40 = vld [vmem:[%s3710_s2 + $0x20] ss:$16 sps:$4 sm:$0xff]   ;;  %v2794_v41 = vld [vmem:[%s3710_s2 + $0x28] ss:$16 sps:$4 sm:$0xff]   ;;  %v2801_v42 = vld [vmem:[%s3710_s2 + $0x44] ss:$16 sps:$4 sm:$0xff]  }
   0xf   :  { %v2806_v43 = vld [vmem:[%s3710_s2 + $0x4c] ss:$16 sps:$4 sm:$0xff]   ;;  %v2816_v45 = vld [vmem:[%s3710_s2 + $0x40] ss:$16 sps:$4 sm:$0xff]   ;;  %v2821_v46 = vld [vmem:[%s3710_s2 + $0x48] ss:$16 sps:$4 sm:$0xff]  }
  0x10   :  { %300 = vmatpush1.bf16.msra.mxu0 %v2319_v15  ;;  %373 = vmatpush1.bf16.msra.mxu1 %v2320_v16  ;;  %v2358_v44 = vld [vmem:[%s3709_s0 + $0x8] sm:$0xff]   ;;  %v2828_v47 = vld [vmem:[%s3710_s2 + $0x64] ss:$16 sps:$4 sm:$0xff]   ;;  %v2840_v49 = vld [vmem:[%s3710_s2 + $0x60] ss:$16 sps:$4 sm:$0xff]   ;;  %v3018_v14 = vshrl.u32 %v3725_v13, 7 }
  0x11   :  { %301 = vmatprep.subr.bf16.mxu0 %v2321_v17  ;;  %374 = vmatprep.subr.bf16.mxu1 %v2323_v18  ;;  %v2835_v48 = vld [vmem:[%s3710_s2 + $0x6c] ss:$16 sps:$4 sm:$0xff]   ;;  %v2845_v50 = vld [vmem:[%s3710_s2 + $0x68] ss:$16 sps:$4 sm:$0xff]   ;;  %v2852_v51 = vld [vmem:[%s3710_s2 + $0x84] ss:$16 sps:$4 sm:$0xff]  }
  0x12   :  { %v2859_v52 = vld [vmem:[%s3710_s2 + $0x8c] ss:$16 sps:$4 sm:$0xff]   ;;  %v2371_v53 = vld [vmem:[%s3709_s0 + $0x10] sm:$0xff]   ;;  %v2869_v54 = vld [vmem:[%s3711_s6] sm:$0xff]  ;;  %3730 = vst [vmem:[#allocation5_spill] sm:$0xff] %v3018_v14  ;;  %v3722_v15 = vsub.s32 2, %v3018_v14 }
  0x13   :  { %v2876_v55 = vld [vmem:[%s3710_s2 + $0x80] ss:$16 sps:$4 sm:$0xff]   ;;  %v2881_v56 = vld [vmem:[%s3710_s2 + $0x88] ss:$16 sps:$4 sm:$0xff]   ;;  %vm483_vm0 = vcmp.gt.s32.totalorder %v2869_v54, 0  ;;  %vm484_vm1 = vcmp.gt.s32.totalorder %v2869_v54, 1 }
  0x14   :  { %302 = vmatpush1.bf16.msra.mxu0 %v2325_v19  ;;  %375 = vmatpush1.bf16.msra.mxu1 %v2326_v20  ;;  %v2889_v57 = vld [vmem:[%s3710_s2 + $0xa4] ss:$16 sps:$4 sm:$0xff]   ;;  %v2894_v58 = vld [vmem:[%s3710_s2 + $0xac] ss:$16 sps:$4 sm:$0xff]   ;;  %v762_v59 = vsel %vm483_vm0, 1, %v3726_v1  ;;  %v884_v62 = vsel %vm484_vm1, 1, %v3726_v1 }
  0x15   :  { %303 = vmatprep.subr.bf16.mxu0 %v2327_v21  ;;  %376 = vmatprep.subr.bf16.mxu1 %v2329_v22  ;;  %v2903_v60 = vld [vmem:[%s3710_s2 + $0xa0] ss:$16 sps:$4 sm:$0xff]   ;;  %v2908_v61 = vld [vmem:[%s3710_s2 + $0xa8] ss:$16 sps:$4 sm:$0xff]   ;;  %v2916_v63 = vld [vmem:[%s3710_s2 + $0xc4] ss:$16 sps:$4 sm:$0xff]  }
  0x16   :  { %764 = vperm.xlu0 %2295, %v762_v59   ;;  %v2921_v0 = vld [vmem:[%s3710_s2 + $0xcc] ss:$16 sps:$4 sm:$0xff]   ;;  %v2933_v3 = vld [vmem:[%s3710_s2 + $0xc0] ss:$16 sps:$4 sm:$0xff]   ;;  %v2938_v4 = vld [vmem:[%s3710_s2 + $0xc8] ss:$16 sps:$4 sm:$0xff]  }
  0x17   :  { %v2384_v2 = vld [vmem:[%s3709_s0 + $0x18] sm:$0xff]   ;;  %v2945_v5 = vld [vmem:[%s3710_s2 + $0xe4] ss:$16 sps:$4 sm:$0xff]   ;;  %vm487_vm2 = vcmp.gt.s32.totalorder %v2869_v54, 4  ;;  %v2958_v7 = vld [vmem:[%s3710_s2 + $0xe0] ss:$16 sps:$4 sm:$0xff]  }
  0x18   :  { %304 = vmatpush1.bf16.msra.mxu0 %v2331_v23  ;;  %377 = vmatpush1.bf16.msra.mxu1 %v2332_v24  ;;  %v2950_v6 = vld [vmem:[%s3710_s2 + $0xec] ss:$16 sps:$4 sm:$0xff]   ;;  %v2963_v8 = vld [vmem:[%s3710_s2 + $0xe8] ss:$16 sps:$4 sm:$0xff]   ;;  %v2968_v9 = vld [vmem:[%s3712_s4] sm:$0xff]  ;;  %v1253_v10 = vsel %vm487_vm2, 1, %v3726_v1 }
  0x19   :  { %305 = vmatprep.subr.bf16.mxu0 %v2333_v25  ;;  %378 = vmatprep.subr.bf16.mxu1 %v2335_v26  ;;  %vm489_vm3 = vcmp.gt.s32.totalorder %v2869_v54, 6  ;;  %v491_v11 = vpack.c.bf16 %v2968_v9, %v2968_v9  ;;  %v3721_v16 = vsub.s32 3, %v3018_v14  ;;  %v3723_v17 = vsub.s32 0, %v3018_v14  ;;  %v87_v18 = vld [vmem:[%s3713_s3] sm:$0xf] }
  0x1a   :  { %886 = vperm.xlu0 %2295, %v884_v62   ;;  %v1499_v12 = vsel %vm489_vm3, 1, %v3726_v1  ;;  %v3724_v19 = vsub.s32 1, %v3018_v14  ;;  %v3029_v20 = vrot.slane %v87_v18, %v3722_v15  ;;  %vm485_vm5 = vcmp.gt.s32.totalorder %v2869_v54, 2 }
  0x1b   :  { %v3037_v23 = vrot.slane %v87_v18, %v3721_v16  ;;  %v92_v24 = vrot.slane %v87_v18, %v3723_v17  ;;  %vm486_vm6 = vcmp.gt.s32.totalorder %v2869_v54, 3  ;;  %vm488_vm7 = vcmp.gt.s32.totalorder %v2869_v54, 5 }
  0x1c   :  { %306 = vmatpush1.bf16.msra.mxu0 %v2337_v27  ;;  %379 = vmatpush1.bf16.msra.mxu1 %v2338_v28  ;;  %v96_v27 = vrot.slane %v87_v18, %v3724_v19  ;;  %vm490_vm8 = vcmp.gt.s32.totalorder %v2869_v54, 7  ;;  %vm1818_vm1 = vcmask 1041409   ;;  %vm1820_vm2 = vcmask 1042434  }
  0x1d   :  { %307 = vmatprep.subr.bf16.mxu0 %v2339_v29  ;;  %380 = vmatprep.subr.bf16.mxu1 %v2341_v30  ;;  %vm1822_vm3 = vcmask 1043459  }
  0x1e   :  { %1255 = vperm.xlu0 %2295, %v1253_v10  }
  0x20   :  { %308 = vmatpush1.bf16.msra.mxu0 %v2343_v31  ;;  %381 = vmatpush1.bf16.msra.mxu1 %v2344_v32 }
  0x21   :  { %652 = vmatprep.subr.bf16.mxu0 %v2752_v33  ;;  %693 = vmatprep.subr.bf16.mxu1 %v2757_v34 }
  0x22   :  { %1501 = vperm.xlu0 %2295, %v1499_v12  }
  0x23   :  { %326 = vmatmul.mubr.bf16.vlgmr.msra.gmra.mrb[0].mxu0 %v2345_v35  ;;  %399 = vmatmul.mubr.bf16.vlgmr.msra.gmra.mrb[0].mxu1 %v2345_v35 }
  0x24   :  { %653 = vmatpush1.bf16.msra.mxu0 %v2765_v36  ;;  %694 = vmatpush1.bf16.msra.mxu1 %v2770_v37 }
  0x25   :  { %654 = vmatprep.subr.bf16.mxu0 %v2777_v38  ;;  %695 = vmatprep.subr.bf16.mxu1 %v2782_v39 }
  0x26   :  { %335 = vmatprep.mubr.bf16.mxu0 %v3726_v1  ;;  %408 = vmatprep.mubr.bf16.mxu1 %v3726_v1 }
  0x28   :  { %655 = vmatpush1.bf16.msra.mxu0 %v2787_v40  ;;  %696 = vmatpush1.bf16.msra.mxu1 %v2794_v41 }
  0x29   :  { %656 = vmatprep.subr.bf16.mxu0 %v2801_v42  ;;  %697 = vmatprep.subr.bf16.mxu1 %v2806_v43 }
  0x2b   :  { %336 = vmatmul.mubr.bf16.gmra.mrb[4].mxu0 %v2358_v44  ;;  %409 = vmatmul.mubr.bf16.gmra.mrb[4].mxu1 %v2358_v44 }
  0x2c   :  { %657 = vmatpush1.bf16.msra.mxu0 %v2816_v45  ;;  %698 = vmatpush1.bf16.msra.mxu1 %v2821_v46 }
  0x2d   :  { %658 = vmatprep.subr.bf16.mxu0 %v2828_v47  ;;  %699 = vmatprep.subr.bf16.mxu1 %v2835_v48 }
  0x2e   :  { %345 = vmatprep.mubr.bf16.mxu0 %v3726_v1  ;;  %418 = vmatprep.mubr.bf16.mxu1 %v3726_v1 }
  0x30   :  { %659 = vmatpush1.bf16.msra.mxu0 %v2840_v49  ;;  %700 = vmatpush1.bf16.msra.mxu1 %v2845_v50 }
  0x31   :  { %660 = vmatprep.subr.bf16.mxu0 %v2852_v51  ;;  %701 = vmatprep.subr.bf16.mxu1 %v2859_v52 }
  0x33   :  { %346 = vmatmul.mubr.bf16.gmra.mrb[8].mxu0 %v2371_v53  ;;  %419 = vmatmul.mubr.bf16.gmra.mrb[8].mxu1 %v2371_v53 }
  0x34   :  { %661 = vmatpush1.bf16.msra.mxu0 %v2876_v55  ;;  %702 = vmatpush1.bf16.msra.mxu1 %v2881_v56 }
  0x35   :  { %662 = vmatprep.subr.bf16.mxu0 %v2889_v57  ;;  %703 = vmatprep.subr.bf16.mxu1 %v2894_v58 }
  0x36   :  { %355 = vmatprep.mubr.bf16.mxu0 %v3726_v1  ;;  %428 = vmatprep.mubr.bf16.mxu1 %v3726_v1 }
  0x38   :  { %663 = vmatpush1.bf16.msra.mxu0 %v2903_v60  ;;  %704 = vmatpush1.bf16.msra.mxu1 %v2908_v61 }
  0x39   :  { %664 = vmatprep.subr.bf16.mxu0 %v2916_v63  ;;  %705 = vmatprep.subr.bf16.mxu1 %v2921_v0 }
  0x3b   :  { %356 = vmatmul.mubr.bf16.gmra.mrb[12].mxu0 %v2384_v2  ;;  %429 = vmatmul.mubr.bf16.gmra.mrb[12].mxu1 %v2384_v2 }
  0x3c   :  { %665 = vmatpush1.bf16.msra.mxu0 %v2933_v3  ;;  %706 = vmatpush1.bf16.msra.mxu1 %v2938_v4 }
  0x3d   :  { %666 = vmatprep.subr.bf16.mxu0 %v2945_v5  ;;  %707 = vmatprep.subr.bf16.mxu1 %v2950_v6 }
  0x3e   :  { %684 = vmatprep.mubr.bf16.mxu0 %v3726_v1  ;;  %725 = vmatprep.mubr.bf16.mxu1 %v3726_v1 }
  0x40   :  { %667 = vmatpush1.bf16.msra.mxu0 %v2958_v7  ;;  %708 = vmatpush1.bf16.msra.mxu1 %v2963_v8 }
  0x41   :  { %774 = vmatprep.subr.bf16.mxu0 %v2752_v33  ;;  %815 = vmatprep.subr.bf16.mxu1 %v2757_v34 }
  0x43   :  { %685 = vmatmul.mubr.bf16.vlgmr.msra.gmra.mrb[16].mxu0 %v491_v11  ;;  %726 = vmatmul.mubr.bf16.vlgmr.msra.gmra.mrb[16].mxu1 %v491_v11 }
  0x44   :  { %775 = vmatpush1.bf16.msra.mxu0 %v2765_v36  ;;  %816 = vmatpush1.bf16.msra.mxu1 %v2770_v37 }
  0x45   :  { %776 = vmatprep.subr.bf16.mxu0 %v2777_v38  ;;  %817 = vmatprep.subr.bf16.mxu1 %v2782_v39 }
  0x46   :  { %806 = vmatprep.mubr.bf16.mxu0 %v3726_v1  ;;  %847 = vmatprep.mubr.bf16.mxu1 %v3726_v1 }
  0x48   :  { %777 = vmatpush1.bf16.msra.mxu0 %v2787_v40  ;;  %818 = vmatpush1.bf16.msra.mxu1 %v2794_v41 }
  0x49   :  { %778 = vmatprep.subr.bf16.mxu0 %v2801_v42  ;;  %819 = vmatprep.subr.bf16.mxu1 %v2806_v43 }
  0x4c   :  { %779 = vmatpush1.bf16.msra.mxu0 %v2816_v45  ;;  %820 = vmatpush1.bf16.msra.mxu1 %v2821_v46 }
  0x4d   :  { %780 = vmatprep.subr.bf16.mxu0 %v2828_v47  ;;  %821 = vmatprep.subr.bf16.mxu1 %v2835_v48 }
  0x50   :  { %781 = vmatpush1.bf16.msra.mxu0 %v2840_v49  ;;  %822 = vmatpush1.bf16.msra.mxu1 %v2845_v50 }
  0x51   :  { %782 = vmatprep.subr.bf16.mxu0 %v2852_v51  ;;  %823 = vmatprep.subr.bf16.mxu1 %v2859_v52 }
  0x54   :  { %783 = vmatpush1.bf16.msra.mxu0 %v2876_v55  ;;  %824 = vmatpush1.bf16.msra.mxu1 %v2881_v56 }
  0x55   :  { %784 = vmatprep.subr.bf16.mxu0 %v2889_v57  ;;  %825 = vmatprep.subr.bf16.mxu1 %v2894_v58 }
  0x58   :  { %785 = vmatpush1.bf16.msra.mxu0 %v2903_v60  ;;  %826 = vmatpush1.bf16.msra.mxu1 %v2908_v61 }
  0x59   :  { %786 = vmatprep.subr.bf16.mxu0 %v2916_v63  ;;  %827 = vmatprep.subr.bf16.mxu1 %v2921_v0 }
  0x5c   :  { %787 = vmatpush1.bf16.msra.mxu0 %v2933_v3  ;;  %828 = vmatpush1.bf16.msra.mxu1 %v2938_v4 }
  0x5d   :  { %788 = vmatprep.subr.bf16.mxu0 %v2945_v5  ;;  %829 = vmatprep.subr.bf16.mxu1 %v2950_v6 }
  0x60   :  { %789 = vmatpush1.bf16.msra.mxu0 %v2958_v7  ;;  %830 = vmatpush1.bf16.msra.mxu1 %v2963_v8 }
  0x61   :  { %897 = vmatprep.subr.bf16.mxu0 %v2752_v33  ;;  %938 = vmatprep.subr.bf16.mxu1 %v2757_v34 }
  0xf6   :  { %v3031_v21 = vpop.f32.mrb[0].mxu0  ;;  %v3033_v22 = vpop.f32.mrb[0].mxu1 }
  0xf7   :  { %v329_v25 = vpop.f32.mrb[1].mxu0  ;;  %v402_v26 = vpop.f32.mrb[1].mxu1 }
  0xf8   :  { %v331_v28 = vpop.f32.mrb[2].mxu0  ;;  %v404_v29 = vpop.f32.mrb[2].mxu1 }
  0xf9   :  { %v3043_v30 = vadd.f32 %v331_v28, %v92_v24  ;;  %v333_v31 = vpop.f32.mrb[3].mxu0  ;;  %v3046_v32 = vadd.f32 %v404_v29, %v3029_v20  ;;  %v406_v35 = vpop.f32.mrb[3].mxu1 }
  0xfa   :  { %v3048_v44 = vadd.f32 %v333_v31, %v96_v27  ;;  %v3051_v53 = vadd.f32 %v406_v35, %v3037_v23 }
  0xfe   :  { %v337_v59 = vpop.f32.mrb[4].mxu0  ;;  %v410_v62 = vpop.f32.mrb[4].mxu1 }
  0xff   :  { %v3053_v2 = vadd.f32 %v337_v59, %v92_v24  ;;  %v339_v10 = vpop.f32.mrb[5].mxu0  ;;  %v3056_v11 = vadd.f32 %v410_v62, %v3029_v20  ;;  %v412_v12 = vpop.f32.mrb[5].mxu1 }
 0x100   :  { %v3058_v18 = vadd.f32 %v339_v10, %v96_v27  ;;  %v341_v28 = vpop.f32.mrb[6].mxu0  ;;  %v3061_v29 = vadd.f32 %v412_v12, %v3037_v23  ;;  %v414_v31 = vpop.f32.mrb[6].mxu1 }
 0x101   :  { %3731 = vst [vmem:[#allocation6_spill] sm:$0xff] %v3056_v11  ;;  %v3063_v16 = vadd.f32 %v341_v28, %v92_v24  ;;  %v343_v35 = vpop.f32.mrb[7].mxu0  ;;  %v3066_v15 = vadd.f32 %v414_v31, %v3029_v20  ;;  %v416_v59 = vpop.f32.mrb[7].mxu1 }
 0x102   :  { %3732 = vst [vmem:[#allocation7_spill] sm:$0xff] %v3058_v18  ;;  %3733 = vst [vmem:[#allocation8_spill] sm:$0xff] %v3061_v29  ;;  %v3068_v17 = vadd.f32 %v343_v35, %v96_v27  ;;  %v3071_v62 = vadd.f32 %v416_v59, %v3037_v23 }
 0x103   :  { %3734 = vst [vmem:[#allocation9_spill] sm:$0xff] %v3063_v16  ;;  %3735 = vst [vmem:[#allocation10_spill] sm:$0xff] %v3066_v15 }
 0x104   :  { %3736 = vst [vmem:[#allocation11_spill] sm:$0xff] %v3068_v17  ;;  %3737 = vst [vmem:[#allocation12_spill] sm:$0xff] %v3071_v62 }
 0x106   :  { %v347_v19 = vpop.f32.mrb[8].mxu0  ;;  %v420_v10 = vpop.f32.mrb[8].mxu1 }
 0x107   :  { %v3073_v13 = vadd.f32 %v347_v19, %v92_v24  ;;  %v349_v1 = vpop.f32.mrb[9].mxu0  ;;  %v3076_v12 = vadd.f32 %v420_v10, %v3029_v20  ;;  %v422_v28 = vpop.f32.mrb[9].mxu1 }
 0x108   :  { %v3078_v14 = vadd.f32 %v349_v1, %v96_v27  ;;  %v351_v16 = vpop.f32.mrb[10].mxu0  ;;  %v3081_v31 = vadd.f32 %v422_v28, %v3037_v23  ;;  %v424_v35 = vpop.f32.mrb[10].mxu1 }
 0x109   :  { %3738 = vst [vmem:[#allocation13_spill] sm:$0xff] %v3073_v13  ;;  %3739 = vst [vmem:[#allocation14_spill] sm:$0xff] %v3076_v12  ;;  %v3083_v17 = vadd.f32 %v351_v16, %v92_v24  ;;  %v353_v59 = vpop.f32.mrb[11].mxu0  ;;  %v3086_v62 = vadd.f32 %v424_v35, %v3029_v20  ;;  %v426_v19 = vpop.f32.mrb[11].mxu1 }
 0x10a   :  { %3740 = vst [vmem:[#allocation15_spill] sm:$0xff] %v3078_v14  ;;  %3741 = vst [vmem:[#allocation16_spill] sm:$0xff] %v3081_v31  ;;  %v3088_v13 = vadd.f32 %v353_v59, %v96_v27  ;;  %v3091_v10 = vadd.f32 %v426_v19, %v3037_v23 }
 0x10b   :  { %3742 = vst [vmem:[#allocation17_spill] sm:$0xff] %v3083_v17  ;;  %3743 = vst [vmem:[#allocation18_spill] sm:$0xff] %v3086_v62 }
 0x10c   :  { %3744 = vst [vmem:[#allocation19_spill] sm:$0xff] %v3088_v13  ;;  %3745 = vst [vmem:[#allocation20_spill] sm:$0xff] %v3091_v10 }
 0x10e   :  { %v357_v12 = vpop.f32.mrb[12].mxu0  ;;  %v430_v1 = vpop.f32.mrb[12].mxu1 }
 0x10f   :  { %v3093_v14 = vadd.f32 %v357_v12, %v92_v24  ;;  %v359_v15 = vpop.f32.mrb[13].mxu0  ;;  %v3096_v28 = vadd.f32 %v430_v1, %v3029_v20  ;;  %v432_v16 = vpop.f32.mrb[13].mxu1 }
 0x110   :  { %v3098_v17 = vadd.f32 %v359_v15, %v96_v27  ;;  %v361_v31 = vpop.f32.mrb[14].mxu0  ;;  %v3101_v35 = vadd.f32 %v432_v16, %v3037_v23  ;;  %v434_v59 = vpop.f32.mrb[14].mxu1  ;;  %v328_v15 = vadd.f32 %v3031_v21, %v92_v24  ;;  %v330_v16 = vadd.f32 %v329_v25, %v96_v27 }
 0x111   :  { %3746 = vst [vmem:[#allocation21_spill] sm:$0xff] %v3093_v14  ;;  %3747 = vst [vmem:[#allocation22_spill] sm:$0xff] %v3096_v28  ;;  %v3103_v13 = vadd.f32 %v361_v31, %v92_v24  ;;  %v363_v19 = vpop.f32.mrb[15].mxu0  ;;  %v3106_v10 = vadd.f32 %v434_v59, %v3029_v20  ;;  %v436_v12 = vpop.f32.mrb[15].mxu1 }
 0x112   :  { %3748 = vst [vmem:[#allocation23_spill] sm:$0xff] %v3098_v17  ;;  %3749 = vst [vmem:[#allocation24_spill] sm:$0xff] %v3101_v35  ;;  %v3108_v14 = vadd.f32 %v363_v19, %v96_v27  ;;  %v3111_v1 = vadd.f32 %v436_v12, %v3037_v23  ;;  %v401_v17 = vadd.f32 %v3033_v22, %v3029_v20  ;;  %v765_v27 = vpop.permute.xlu0 %764 }
 0x113   :  { %3750 = vst [vmem:[#allocation25_spill] sm:$0xff] %v3103_v13  ;;  %3751 = vst [vmem:[#allocation26_spill] sm:$0xff] %v3106_v10  ;;  %v403_v35 = vadd.f32 %v402_v26, %v3037_v23  ;;  %vm766_vm4 = vcmp.eq.s32.totalorder %v765_v27, 1 }
 0x114   :  { %3752 = vst [vmem:[#allocation27_spill] sm:$0xff] %v3108_v14  ;;  %3753 = vst [vmem:[#allocation28_spill] sm:$0xff] %v3111_v1 }
 0x116   :  { %v686_v31 = vpop.f32.mrb[16].mxu0  ;;  %v727_v13 = vpop.f32.mrb[16].mxu1 }
 0x117   :  { %v734_v28 = vadd.f32 %v686_v31, %v328_v15  ;;  %v736_v62 = vadd.f32 %v727_v13, %v401_v17  ;;  %v688_v59 = vpop.f32.mrb[17].mxu0  ;;  %v729_v10 = vpop.f32.mrb[17].mxu1 }
 0x118   :  { %v735_v29 = vadd.f32 %v688_v59, %v330_v16  ;;  %v737_v19 = vadd.f32 %v729_v10, %v403_v35  ;;  %v690_v14 = vpop.f32.mrb[18].mxu0  ;;  %v731_v18 = vpop.f32.mrb[18].mxu1 }
 0x119   :  { %v2193_v12 = vmul.f32 -1.442695, %v734_v28  ;;  %v691_v1 = vpop.f32.mrb[19].mxu0  ;;  %v732_v11 = vpop.f32.mrb[19].mxu1  ;;  %v45_v14 = vld [vmem:[%s3714_s5] sm:$0xff] }
 0x11a   :  { %v2194_v21 = vmul.f32 -1.442695, %v735_v29  ;;  %v2195_v20 = vmul.f32 -1.442695, %v737_v19  ;;  %v3754_v19 = vmov 0  }
 0x11b   :  { %2413 = vpow2.f32 %v2193_v12  ;;  %v1130_v12 = vsel %vm486_vm6, 1, %v3754_v19  ;;  %vm1828_vm6 = vcmask 1046534  }
 0x11c   :  { %2415 = vpow2.f32 %v2194_v21  ;;  %v1376_v21 = vsel %vm488_vm7, 1, %v3754_v19  ;;  %vm1830_vm7 = vcmask 1047559  }
 0x11d   :  { %2417 = vpow2.f32 %v2195_v20  ;;  %v1622_v20 = vsel %vm490_vm8, 1, %v3754_v19  ;;  %vm1865_vm8 = vcmask 64512  }
 0x11e   :  { %2419 = vtanh.f32 %v736_v62 }
 0x125   :  { %v2414_v22 = vpop.eup %2413 }
 0x126   :  { %v2416_v24 = vpop.eup %2415  ;;  %v741_v23 = vadd.f32 1.0, %v2414_v22 }
 0x127   :  { %v747_v25 = vadd.f32 1.0, %v2416_v24  ;;  %v2418_v13 = vpop.eup %2417 }
 0x128   :  { %2421 = vrcp.f32 %v741_v23  ;;  %v2420_v17 = vpop.eup %2419  ;;  %v754_v18 = vadd.f32 1.0, %v2418_v13 }
 0x129   :  { %2423 = vrcp.f32 %v747_v25 }
 0x12a   :  { %2425 = vrcp.f32 %v754_v18 }
 0x132   :  { %v2422_v26 = vpop.eup %2421 }
 0x133   :  { %v2424_v11 = vpop.eup %2423  ;;  %v758_v29 = vmul.f32 %v2422_v26, %v2420_v17 }
 0x134   :  { %v757_v10 = vmul.f32 %v2424_v11, %v45_v14  ;;  %v2426_v35 = vpop.eup %2425 }
 0x136   :  { %v759_v28 = vadd.f32 %v758_v29, %v757_v10 }
 0x138   :  { %2427 = vtanh.f32 %v759_v28  ;;  %v3120_v62 = vsel %vm766_vm4, %v759_v28, %v45_v14 }
 0x142   :  { %v2428_v1 = vpop.eup %2427 }
 0x143   :  { %v761_v15 = vmul.f32 %v2428_v1, %v2426_v35 }
 0x145   :  { %v3123_v16 = vsel %vm766_vm4, %v761_v15, %v2968_v9  ;;  %v3125_v31 = vsel %vm766_vm4, %v761_v15, 0.0  ;;  %v1007_v9 = vsel %vm485_vm5, 1, %v3754_v19  ;;  %vm1824_vm4 = vcmask 1044484  }
 0x146   :  { %v773_v59 = vpack.c.bf16 %v3123_v16, %v3123_v16  ;;  %1009 = vperm.xlu1 %2296, %v1007_v9   ;;  %vm1826_vm5 = vcmask 1045509  }
 0x148   :  { %807 = vmatmul.mubr.bf16.vlgmr.msra.gmra.mrb[20].mxu0 %v773_v59  ;;  %848 = vmatmul.mubr.bf16.vlgmr.msra.gmra.mrb[20].mxu1 %v773_v59 }
 0x149   :  { %898 = vmatpush1.bf16.msra.mxu0 %v2765_v36  ;;  %939 = vmatpush1.bf16.msra.mxu1 %v2770_v37 }
 0x14a   :  { %899 = vmatprep.subr.bf16.mxu0 %v2777_v38  ;;  %940 = vmatprep.subr.bf16.mxu1 %v2782_v39 }
 0x14b   :  { %929 = vmatprep.mubr.bf16.mxu0 %v3754_v19  ;;  %970 = vmatprep.mubr.bf16.mxu1 %v3754_v19 }
 0x14c   :  { %1132 = vperm.xlu1 %2296, %v1130_v12  }
 0x14d   :  { %900 = vmatpush1.bf16.msra.mxu0 %v2787_v40  ;;  %941 = vmatpush1.bf16.msra.mxu1 %v2794_v41 }
 0x14e   :  { %901 = vmatprep.subr.bf16.mxu0 %v2801_v42  ;;  %942 = vmatprep.subr.bf16.mxu1 %v2806_v43 }
 0x150   :  { %1378 = vperm.xlu1 %2296, %v1376_v21  }
 0x151   :  { %902 = vmatpush1.bf16.msra.mxu0 %v2816_v45  ;;  %943 = vmatpush1.bf16.msra.mxu1 %v2821_v46 }
 0x152   :  { %903 = vmatprep.subr.bf16.mxu0 %v2828_v47  ;;  %944 = vmatprep.subr.bf16.mxu1 %v2835_v48 }
 0x154   :  { %1624 = vperm.xlu1 %2296, %v1622_v20   ;;  %v887_v20 = vpop.permute.xlu0 %886 }
 0x155   :  { %904 = vmatpush1.bf16.msra.mxu0 %v2840_v49  ;;  %945 = vmatpush1.bf16.msra.mxu1 %v2845_v50  ;;  %vm888_vm9 = vcmp.eq.s32.totalorder %v887_v20, 1 }
 0x156   :  { %905 = vmatprep.subr.bf16.mxu0 %v2852_v51  ;;  %946 = vmatprep.subr.bf16.mxu1 %v2859_v52 }
 0x159   :  { %906 = vmatpush1.bf16.msra.mxu0 %v2876_v55  ;;  %947 = vmatpush1.bf16.msra.mxu1 %v2881_v56 }
 0x15a   :  { %907 = vmatprep.subr.bf16.mxu0 %v2889_v57  ;;  %948 = vmatprep.subr.bf16.mxu1 %v2894_v58 }
 0x15d   :  { %908 = vmatpush1.bf16.msra.mxu0 %v2903_v60  ;;  %949 = vmatpush1.bf16.msra.mxu1 %v2908_v61 }
 0x15e   :  { %909 = vmatprep.subr.bf16.mxu0 %v2916_v63  ;;  %950 = vmatprep.subr.bf16.mxu1 %v2921_v0 }
 0x161   :  { %910 = vmatpush1.bf16.msra.mxu0 %v2933_v3  ;;  %951 = vmatpush1.bf16.msra.mxu1 %v2938_v4 }
 0x162   :  { %911 = vmatprep.subr.bf16.mxu0 %v2945_v5  ;;  %952 = vmatprep.subr.bf16.mxu1 %v2950_v6 }
 0x165   :  { %912 = vmatpush1.bf16.msra.mxu0 %v2958_v7  ;;  %953 = vmatpush1.bf16.msra.mxu1 %v2963_v8 }
 0x166   :  { %1020 = vmatprep.subr.bf16.mxu0 %v2752_v33  ;;  %1061 = vmatprep.subr.bf16.mxu1 %v2757_v34 }
 0x21b   :  { %v808_v22 = vpop.f32.mrb[20].mxu0  ;;  %v849_v24 = vpop.f32.mrb[20].mxu1 }
 0x21c   :  { %v856_v23 = vadd.f32 %v808_v22, %v3043_v30  ;;  %v858_v25 = vadd.f32 %v849_v24, %v3046_v32  ;;  %v810_v13 = vpop.f32.mrb[21].mxu0  ;;  %v851_v17 = vpop.f32.mrb[21].mxu1 }
 0x21d   :  { %v857_v14 = vadd.f32 %v810_v13, %v3048_v44  ;;  %v859_v26 = vadd.f32 %v851_v17, %v3051_v53  ;;  %v812_v27 = vpop.f32.mrb[22].mxu0  ;;  %v853_v11 = vpop.f32.mrb[22].mxu1 }
 0x21e   :  { %v2196_v18 = vmul.f32 -1.442695, %v856_v23  ;;  %v813_v54 = vpop.f32.mrb[23].mxu0  ;;  %v854_v29 = vpop.f32.mrb[23].mxu1  ;;  %v3755_v11 = vld [vmem:[#allocation6_spill] sm:$0xff] }
 0x21f   :  { %v2197_v10 = vmul.f32 -1.442695, %v857_v14  ;;  %v2198_v28 = vmul.f32 -1.442695, %v859_v26 }
 0x220   :  { %2429 = vpow2.f32 %v2196_v18 }
 0x221   :  { %2431 = vpow2.f32 %v2197_v10  ;;  %v3756_v10 = vld [vmem:[#allocation7_spill] sm:$0xff] }
 0x222   :  { %2433 = vpow2.f32 %v2198_v28 }
 0x223   :  { %2435 = vtanh.f32 %v858_v25 }
 0x22a   :  { %v2430_v35 = vpop.eup %2429 }
 0x22b   :  { %v2432_v1 = vpop.eup %2431  ;;  %v863_v30 = vadd.f32 1.0, %v2430_v35  ;;  %v3757_v35 = vld [vmem:[#allocation8_spill] sm:$0xff] }
 0x22c   :  { %v869_v32 = vadd.f32 1.0, %v2432_v1  ;;  %v2434_v44 = vpop.eup %2433 }
 0x22d   :  { %2437 = vrcp.f32 %v863_v30  ;;  %v2436_v15 = vpop.eup %2435  ;;  %v876_v12 = vadd.f32 1.0, %v2434_v44 }
 0x22e   :  { %2439 = vrcp.f32 %v869_v32 }
 0x22f   :  { %2441 = vrcp.f32 %v876_v12 }
 0x237   :  { %v2438_v53 = vpop.eup %2437 }
 0x238   :  { %v2440_v59 = vpop.eup %2439  ;;  %v880_v9 = vmul.f32 %v2438_v53, %v2436_v15 }
 0x239   :  { %v879_v21 = vmul.f32 %v2440_v59, %v3120_v62  ;;  %v2442_v23 = vpop.eup %2441 }
 0x23b   :  { %v881_v22 = vadd.f32 %v880_v9, %v879_v21 }
 0x23d   :  { %2443 = vtanh.f32 %v881_v22  ;;  %v3177_v24 = vsel %vm888_vm9, %v881_v22, %v3120_v62 }
 0x247   :  { %v2444_v25 = vpop.eup %2443 }
 0x248   :  { %v883_v13 = vmul.f32 %v2444_v25, %v2442_v23 }
 0x24a   :  { %v3180_v17 = vsel %vm888_vm9, %v883_v13, %v3123_v16  ;;  %v3182_v14 = vsel %vm888_vm9, %v883_v13, 0.0  ;;  %v1010_v13 = vpop.permute.xlu1 %1009 }
 0x24b   :  { %v896_v26 = vpack.c.bf16 %v3180_v17, %v3180_v17  ;;  %vm1011_vm10 = vcmp.eq.s32.totalorder %v1010_v13, 1 }
 0x24d   :  { %930 = vmatmul.mubr.bf16.vlgmr.msra.gmra.mrb[24].mxu0 %v896_v26  ;;  %971 = vmatmul.mubr.bf16.vlgmr.msra.gmra.mrb[24].mxu1 %v896_v26 }
 0x24e   :  { %1021 = vmatpush1.bf16.msra.mxu0 %v2765_v36  ;;  %1062 = vmatpush1.bf16.msra.mxu1 %v2770_v37 }
 0x24f   :  { %1022 = vmatprep.subr.bf16.mxu0 %v2777_v38  ;;  %1063 = vmatprep.subr.bf16.mxu1 %v2782_v39 }
 0x250   :  { %1052 = vmatprep.mubr.bf16.mxu0 %v3754_v19  ;;  %1093 = vmatprep.mubr.bf16.mxu1 %v3754_v19 }
 0x252   :  { %1023 = vmatpush1.bf16.msra.mxu0 %v2787_v40  ;;  %1064 = vmatpush1.bf16.msra.mxu1 %v2794_v41 }
 0x253   :  { %1024 = vmatprep.subr.bf16.mxu0 %v2801_v42  ;;  %1065 = vmatprep.subr.bf16.mxu1 %v2806_v43 }
 0x256   :  { %1025 = vmatpush1.bf16.msra.mxu0 %v2816_v45  ;;  %1066 = vmatpush1.bf16.msra.mxu1 %v2821_v46 }
 0x257   :  { %1026 = vmatprep.subr.bf16.mxu0 %v2828_v47  ;;  %1067 = vmatprep.subr.bf16.mxu1 %v2835_v48 }
 0x25a   :  { %1027 = vmatpush1.bf16.msra.mxu0 %v2840_v49  ;;  %1068 = vmatpush1.bf16.msra.mxu1 %v2845_v50 }
 0x25b   :  { %1028 = vmatprep.subr.bf16.mxu0 %v2852_v51  ;;  %1069 = vmatprep.subr.bf16.mxu1 %v2859_v52 }
 0x25e   :  { %1029 = vmatpush1.bf16.msra.mxu0 %v2876_v55  ;;  %1070 = vmatpush1.bf16.msra.mxu1 %v2881_v56 }
 0x25f   :  { %1030 = vmatprep.subr.bf16.mxu0 %v2889_v57  ;;  %1071 = vmatprep.subr.bf16.mxu1 %v2894_v58 }
 0x262   :  { %1031 = vmatpush1.bf16.msra.mxu0 %v2903_v60  ;;  %1072 = vmatpush1.bf16.msra.mxu1 %v2908_v61 }
 0x263   :  { %1032 = vmatprep.subr.bf16.mxu0 %v2916_v63  ;;  %1073 = vmatprep.subr.bf16.mxu1 %v2921_v0 }
 0x266   :  { %1033 = vmatpush1.bf16.msra.mxu0 %v2933_v3  ;;  %1074 = vmatpush1.bf16.msra.mxu1 %v2938_v4 }
 0x267   :  { %1034 = vmatprep.subr.bf16.mxu0 %v2945_v5  ;;  %1075 = vmatprep.subr.bf16.mxu1 %v2950_v6 }
 0x26a   :  { %1035 = vmatpush1.bf16.msra.mxu0 %v2958_v7  ;;  %1076 = vmatpush1.bf16.msra.mxu1 %v2963_v8 }
 0x26b   :  { %1143 = vmatprep.subr.bf16.mxu0 %v2752_v33  ;;  %1184 = vmatprep.subr.bf16.mxu1 %v2757_v34 }
 0x320   :  { %v931_v62 = vpop.f32.mrb[24].mxu0  ;;  %v972_v16 = vpop.f32.mrb[24].mxu1 }
 0x321   :  { %v979_v27 = vadd.f32 %v931_v62, %v3053_v2  ;;  %v981_v18 = vadd.f32 %v972_v16, %v3755_v11  ;;  %v933_v54 = vpop.f32.mrb[25].mxu0  ;;  %v974_v29 = vpop.f32.mrb[25].mxu1 }
 0x322   :  { %v980_v28 = vadd.f32 %v933_v54, %v3756_v10  ;;  %v982_v1 = vadd.f32 %v974_v29, %v3757_v35  ;;  %v935_v30 = vpop.f32.mrb[26].mxu0  ;;  %v976_v32 = vpop.f32.mrb[26].mxu1 }
 0x323   :  { %v2199_v44 = vmul.f32 -1.442695, %v979_v27  ;;  %v936_v15 = vpop.f32.mrb[27].mxu0  ;;  %v977_v53 = vpop.f32.mrb[27].mxu1 }
 0x324   :  { %v2200_v59 = vmul.f32 -1.442695, %v980_v28  ;;  %v2201_v9 = vmul.f32 -1.442695, %v982_v1 }
 0x325   :  { %2445 = vpow2.f32 %v2199_v44 }
 0x326   :  { %2447 = vpow2.f32 %v2200_v59 }
 0x327   :  { %2449 = vpow2.f32 %v2201_v9 }
 0x328   :  { %2451 = vtanh.f32 %v981_v18 }
 0x32f   :  { %v2446_v12 = vpop.eup %2445 }
 0x330   :  { %v2448_v21 = vpop.eup %2447  ;;  %v986_v2 = vadd.f32 1.0, %v2446_v12 }
 0x331   :  { %v992_v20 = vadd.f32 1.0, %v2448_v21  ;;  %v2450_v22 = vpop.eup %2449 }
 0x332   :  { %2453 = vrcp.f32 %v986_v2  ;;  %v2452_v23 = vpop.eup %2451  ;;  %v999_v62 = vadd.f32 1.0, %v2450_v22 }
 0x333   :  { %2455 = vrcp.f32 %v992_v20 }
 0x334   :  { %2457 = vrcp.f32 %v999_v62  ;;  %v1133_v62 = vpop.permute.xlu1 %1132 }
 0x335   :  { %vm1134_vm11 = vcmp.eq.s32.totalorder %v1133_v62, 1  ;;  %v3408_v62 = vld [vmem:[%s3710_s2 + $0x64] ss:$16 sps:$4 sm:$0xff]  }
 0x33c   :  { %v2454_v25 = vpop.eup %2453 }
 0x33d   :  { %v2456_v26 = vpop.eup %2455  ;;  %v1003_v16 = vmul.f32 %v2454_v25, %v2452_v23 }
 0x33e   :  { %v1002_v27 = vmul.f32 %v2456_v26, %v3177_v24  ;;  %v2458_v18 = vpop.eup %2457 }
 0x340   :  { %v1004_v11 = vadd.f32 %v1003_v16, %v1002_v27 }
 0x342   :  { %2459 = vtanh.f32 %v1004_v11  ;;  %v3226_v54 = vsel %vm1011_vm10, %v1004_v11, %v3177_v24  ;;  %v3761_v24 = vld [vmem:[#allocation12_spill] sm:$0xff] }
 0x34c   :  { %v2460_v29 = vpop.eup %2459 }
 0x34d   :  { %v1006_v10 = vmul.f32 %v2460_v29, %v2458_v18 }
 0x34f   :  { %v3229_v28 = vsel %vm1011_vm10, %v1006_v10, %v3180_v17  ;;  %v3231_v35 = vsel %vm1011_vm10, %v1006_v10, 0.0 }
 0x350   :  { %v1019_v1 = vpack.c.bf16 %v3229_v28, %v3229_v28 }
 0x352   :  { %1053 = vmatmul.mubr.bf16.vlgmr.msra.gmra.mrb[28].mxu0 %v1019_v1  ;;  %1094 = vmatmul.mubr.bf16.vlgmr.msra.gmra.mrb[28].mxu1 %v1019_v1 }
 0x353   :  { %1144 = vmatpush1.bf16.msra.mxu0 %v2765_v36  ;;  %1185 = vmatpush1.bf16.msra.mxu1 %v2770_v37 }
 0x354   :  { %1145 = vmatprep.subr.bf16.mxu0 %v2777_v38  ;;  %1186 = vmatprep.subr.bf16.mxu1 %v2782_v39  ;;  %v3758_v38 = vld [vmem:[#allocation9_spill] sm:$0xff] }
 0x355   :  { %1175 = vmatprep.mubr.bf16.mxu0 %v3754_v19  ;;  %1216 = vmatprep.mubr.bf16.mxu1 %v3754_v19 }
 0x357   :  { %1146 = vmatpush1.bf16.msra.mxu0 %v2787_v40  ;;  %1187 = vmatpush1.bf16.msra.mxu1 %v2794_v41  ;;  %v3759_v40 = vld [vmem:[#allocation10_spill] sm:$0xff] }
 0x358   :  { %1147 = vmatprep.subr.bf16.mxu0 %v2801_v42  ;;  %1188 = vmatprep.subr.bf16.mxu1 %v2806_v43 }
 0x35b   :  { %1148 = vmatpush1.bf16.msra.mxu0 %v2816_v45  ;;  %1189 = vmatpush1.bf16.msra.mxu1 %v2821_v46  ;;  %v3760_v45 = vld [vmem:[#allocation11_spill] sm:$0xff] }
 0x35c   :  { %1149 = vmatprep.subr.bf16.mxu0 %v2828_v47  ;;  %1190 = vmatprep.subr.bf16.mxu1 %v2835_v48 }
 0x35f   :  { %1150 = vmatpush1.bf16.msra.mxu0 %v2840_v49  ;;  %1191 = vmatpush1.bf16.msra.mxu1 %v2845_v50 }
 0x360   :  { %1151 = vmatprep.subr.bf16.mxu0 %v2852_v51  ;;  %1192 = vmatprep.subr.bf16.mxu1 %v2859_v52 }
 0x363   :  { %1152 = vmatpush1.bf16.msra.mxu0 %v2876_v55  ;;  %1193 = vmatpush1.bf16.msra.mxu1 %v2881_v56 }
 0x364   :  { %1153 = vmatprep.subr.bf16.mxu0 %v2889_v57  ;;  %1194 = vmatprep.subr.bf16.mxu1 %v2894_v58 }
 0x367   :  { %1154 = vmatpush1.bf16.msra.mxu0 %v2903_v60  ;;  %1195 = vmatpush1.bf16.msra.mxu1 %v2908_v61 }
 0x368   :  { %1155 = vmatprep.subr.bf16.mxu0 %v2916_v63  ;;  %1196 = vmatprep.subr.bf16.mxu1 %v2921_v0 }
 0x36b   :  { %1156 = vmatpush1.bf16.msra.mxu0 %v2933_v3  ;;  %1197 = vmatpush1.bf16.msra.mxu1 %v2938_v4 }
 0x36c   :  { %1157 = vmatprep.subr.bf16.mxu0 %v2945_v5  ;;  %1198 = vmatprep.subr.bf16.mxu1 %v2950_v6 }
 0x36f   :  { %1158 = vmatpush1.bf16.msra.mxu0 %v2958_v7  ;;  %1199 = vmatpush1.bf16.msra.mxu1 %v2963_v8 }
 0x370   :  { %1266 = vmatprep.subr.bf16.mxu0 %v2752_v33  ;;  %1307 = vmatprep.subr.bf16.mxu1 %v2757_v34 }
 0x425   :  { %v1054_v36 = vpop.f32.mrb[28].mxu0  ;;  %v1095_v37 = vpop.f32.mrb[28].mxu1 }
 0x426   :  { %v1102_v39 = vadd.f32 %v1054_v36, %v3758_v38  ;;  %v1104_v41 = vadd.f32 %v1095_v37, %v3759_v40  ;;  %v1056_v42 = vpop.f32.mrb[29].mxu0  ;;  %v1097_v43 = vpop.f32.mrb[29].mxu1  ;;  %v3287_v37 = vld [vmem:[%s3710_s2] ss:$16 sps:$4 sm:$0xff]   ;;  %v3305_v38 = vld [vmem:[%s3710_s2 + $0x2c] ss:$16 sps:$4 sm:$0xff]  }
 0x427   :  { %v1103_v46 = vadd.f32 %v1056_v42, %v3760_v45  ;;  %v1105_v17 = vadd.f32 %v1097_v43, %v3761_v24  ;;  %v1058_v30 = vpop.f32.mrb[30].mxu0  ;;  %v1099_v32 = vpop.f32.mrb[30].mxu1  ;;  %v3319_v40 = vld [vmem:[%s3710_s2 + $0x28] ss:$16 sps:$4 sm:$0xff]   ;;  %v3331_v42 = vld [vmem:[%s3710_s2 + $0x4c] ss:$16 sps:$4 sm:$0xff]  }
 0x428   :  { %v2202_v44 = vmul.f32 -1.442695, %v1102_v39  ;;  %v1059_v15 = vpop.f32.mrb[31].mxu0  ;;  %v1100_v53 = vpop.f32.mrb[31].mxu1  ;;  %v3313_v39 = vld [vmem:[%s3710_s2 + $0x20] ss:$16 sps:$4 sm:$0xff]  }
 0x429   :  { %v2203_v33 = vmul.f32 -1.442695, %v1103_v46  ;;  %v2204_v34 = vmul.f32 -1.442695, %v1105_v17  ;;  %v3337_v43 = vld [vmem:[%s3710_s2 + $0x40] ss:$16 sps:$4 sm:$0xff]  }
 0x42a   :  { %2461 = vpow2.f32 %v2202_v44  ;;  %v3343_v45 = vld [vmem:[%s3710_s2 + $0x48] ss:$16 sps:$4 sm:$0xff]  }
 0x42b   :  { %2463 = vpow2.f32 %v2203_v33 }
 0x42c   :  { %2465 = vpow2.f32 %v2204_v34 }
 0x42d   :  { %2467 = vtanh.f32 %v1104_v41  ;;  %v3325_v41 = vld [vmem:[%s3710_s2 + $0x44] ss:$16 sps:$4 sm:$0xff]  }
 0x434   :  { %v2462_v59 = vpop.eup %2461 }
 0x435   :  { %v2464_v9 = vpop.eup %2463  ;;  %v1109_v12 = vadd.f32 1.0, %v2462_v59 }
 0x436   :  { %v1115_v21 = vadd.f32 1.0, %v2464_v9  ;;  %v2466_v2 = vpop.eup %2465 }
 0x437   :  { %2469 = vrcp.f32 %v1109_v12  ;;  %v2468_v20 = vpop.eup %2467  ;;  %v1122_v13 = vadd.f32 1.0, %v2466_v2  ;;  %v1256_v12 = vpop.permute.xlu0 %1255 }
 0x438   :  { %2471 = vrcp.f32 %v1115_v21  ;;  %vm1257_vm12 = vcmp.eq.s32.totalorder %v1256_v12, 1 }
 0x439   :  { %2473 = vrcp.f32 %v1122_v13 }
 0x441   :  { %v2470_v22 = vpop.eup %2469 }
 0x442   :  { %v2472_v23 = vpop.eup %2471  ;;  %v1126_v25 = vmul.f32 %v2470_v22, %v2468_v20 }
 0x443   :  { %v1125_v26 = vmul.f32 %v2472_v23, %v3226_v54  ;;  %v2474_v11 = vpop.eup %2473 }
 0x445   :  { %v1127_v16 = vadd.f32 %v1126_v25, %v1125_v26 }
 0x447   :  { %2475 = vtanh.f32 %v1127_v16  ;;  %v3275_v27 = vsel %vm1134_vm11, %v1127_v16, %v3226_v54  ;;  %v3293_v54 = vld [vmem:[%s3710_s2 + $0x8] ss:$16 sps:$4 sm:$0xff]   ;;  %v3414_v16 = vld [vmem:[%s3710_s2 + $0x6c] ss:$16 sps:$4 sm:$0xff]  }
 0x451   :  { %v2476_v18 = vpop.eup %2475 }
 0x452   :  { %v1129_v29 = vmul.f32 %v2476_v18, %v2474_v11  ;;  %v3426_v11 = vld [vmem:[%s3710_s2 + $0x68] ss:$16 sps:$4 sm:$0xff]   ;;  %v3432_v18 = vld [vmem:[%s3710_s2 + $0x84] ss:$16 sps:$4 sm:$0xff]  }
 0x454   :  { %v3278_v10 = vsel %vm1134_vm11, %v1129_v29, %v3229_v28  ;;  %v3280_v1 = vsel %vm1134_vm11, %v1129_v29, 0.0  ;;  %v3299_v28 = vld [vmem:[%s3710_s2 + $0x24] ss:$16 sps:$4 sm:$0xff]   ;;  %v3438_v29 = vld [vmem:[%s3710_s2 + $0x8c] ss:$16 sps:$4 sm:$0xff]  }
 0x455   :  { %v1142_v36 = vpack.c.bf16 %v3278_v10, %v3278_v10 }
 0x457   :  { %1176 = vmatmul.mubr.bf16.vlgmr.msra.gmra.mrb[32].mxu0 %v1142_v36  ;;  %1217 = vmatmul.mubr.bf16.vlgmr.msra.gmra.mrb[32].mxu1 %v1142_v36  ;;  %v3450_v36 = vld [vmem:[%s3710_s2 + $0x88] ss:$16 sps:$4 sm:$0xff]  }
 0x458   :  { %1267 = vmatpush1.bf16.msra.mxu0 %v3287_v37  ;;  %1308 = vmatpush1.bf16.msra.mxu1 %v3293_v54 }
 0x459   :  { %1268 = vmatprep.subr.bf16.mxu0 %v3299_v28  ;;  %1309 = vmatprep.subr.bf16.mxu1 %v3305_v38 }
 0x45a   :  { %1298 = vmatprep.mubr.bf16.mxu0 %v3754_v19  ;;  %1339 = vmatprep.mubr.bf16.mxu1 %v3754_v19 }
 0x45c   :  { %1269 = vmatpush1.bf16.msra.mxu0 %v3313_v39  ;;  %1310 = vmatpush1.bf16.msra.mxu1 %v3319_v40 }
 0x45d   :  { %1270 = vmatprep.subr.bf16.mxu0 %v3325_v41  ;;  %1311 = vmatprep.subr.bf16.mxu1 %v3331_v42 }
 0x460   :  { %1271 = vmatpush1.bf16.msra.mxu0 %v3337_v43  ;;  %1312 = vmatpush1.bf16.msra.mxu1 %v3343_v45 }
 0x461   :  { %1272 = vmatprep.subr.bf16.mxu0 %v2828_v47  ;;  %1313 = vmatprep.subr.bf16.mxu1 %v2835_v48  ;;  %v3369_v47 = vld [vmem:[%s3710_s2 + $0x4] ss:$16 sps:$4 sm:$0xff]   ;;  %v3375_v48 = vld [vmem:[%s3710_s2 + $0xc] ss:$16 sps:$4 sm:$0xff]  }
 0x464   :  { %1273 = vmatpush1.bf16.msra.mxu0 %v2840_v49  ;;  %1314 = vmatpush1.bf16.msra.mxu1 %v2845_v50 }
 0x465   :  { %1274 = vmatprep.subr.bf16.mxu0 %v2852_v51  ;;  %1315 = vmatprep.subr.bf16.mxu1 %v2859_v52  ;;  %v3762_v51 = vld [vmem:[#allocation13_spill] sm:$0xff] }
 0x468   :  { %1275 = vmatpush1.bf16.msra.mxu0 %v2876_v55  ;;  %1316 = vmatpush1.bf16.msra.mxu1 %v2881_v56  ;;  %v3763_v55 = vld [vmem:[#allocation14_spill] sm:$0xff] }
 0x469   :  { %1276 = vmatprep.subr.bf16.mxu0 %v2889_v57  ;;  %1317 = vmatprep.subr.bf16.mxu1 %v2894_v58 }
 0x46c   :  { %1277 = vmatpush1.bf16.msra.mxu0 %v2903_v60  ;;  %1318 = vmatpush1.bf16.msra.mxu1 %v2908_v61  ;;  %v3764_v60 = vld [vmem:[#allocation15_spill] sm:$0xff] }
 0x46d   :  { %1278 = vmatprep.subr.bf16.mxu0 %v2916_v63  ;;  %1319 = vmatprep.subr.bf16.mxu1 %v2921_v0  ;;  %v3765_v63 = vld [vmem:[#allocation16_spill] sm:$0xff] }
 0x470   :  { %1279 = vmatpush1.bf16.msra.mxu0 %v2933_v3  ;;  %1320 = vmatpush1.bf16.msra.mxu1 %v2938_v4 }
 0x471   :  { %1280 = vmatprep.subr.bf16.mxu0 %v2945_v5  ;;  %1321 = vmatprep.subr.bf16.mxu1 %v2950_v6 }
 0x474   :  { %1281 = vmatpush1.bf16.msra.mxu0 %v2958_v7  ;;  %1322 = vmatpush1.bf16.msra.mxu1 %v2963_v8 }
 0x475   :  { %1389 = vmatprep.subr.bf16.mxu0 %v3369_v47  ;;  %1430 = vmatprep.subr.bf16.mxu1 %v3375_v48 }
 0x52a   :  { %v1177_v49 = vpop.f32.mrb[32].mxu0  ;;  %v1218_v50 = vpop.f32.mrb[32].mxu1 }
 0x52b   :  { %v1225_v52 = vadd.f32 %v1177_v49, %v3762_v51  ;;  %v1227_v56 = vadd.f32 %v1218_v50, %v3763_v55  ;;  %v1179_v57 = vpop.f32.mrb[33].mxu0  ;;  %v1220_v58 = vpop.f32.mrb[33].mxu1  ;;  %v3456_v49 = vld [vmem:[%s3710_s2 + $0xa4] ss:$16 sps:$4 sm:$0xff]   ;;  %v3462_v50 = vld [vmem:[%s3710_s2 + $0xac] ss:$16 sps:$4 sm:$0xff]  }
 0x52c   :  { %v1226_v61 = vadd.f32 %v1179_v57, %v3764_v60  ;;  %v1228_v0 = vadd.f32 %v1220_v58, %v3765_v63  ;;  %v1181_v3 = vpop.f32.mrb[34].mxu0  ;;  %v1222_v4 = vpop.f32.mrb[34].mxu1  ;;  %v3468_v51 = vld [vmem:[%s3710_s2 + $0xa0] ss:$16 sps:$4 sm:$0xff]   ;;  %v3480_v55 = vld [vmem:[%s3710_s2 + $0xc4] ss:$16 sps:$4 sm:$0xff]  }
 0x52d   :  { %v2205_v5 = vmul.f32 -1.442695, %v1225_v52  ;;  %v1182_v6 = vpop.f32.mrb[35].mxu0  ;;  %v1223_v7 = vpop.f32.mrb[35].mxu1  ;;  %v3474_v52 = vld [vmem:[%s3710_s2 + $0xa8] ss:$16 sps:$4 sm:$0xff]  }
 0x52e   :  { %v2206_v8 = vmul.f32 -1.442695, %v1226_v61  ;;  %v2207_v46 = vmul.f32 -1.442695, %v1228_v0  ;;  %v3492_v57 = vld [vmem:[%s3710_s2 + $0xc0] ss:$16 sps:$4 sm:$0xff]  }
 0x52f   :  { %2477 = vpow2.f32 %v2205_v5  ;;  %v3498_v58 = vld [vmem:[%s3710_s2 + $0xc8] ss:$16 sps:$4 sm:$0xff]   ;;  %v3504_v60 = vld [vmem:[%s3710_s2 + $0xe4] ss:$16 sps:$4 sm:$0xff]   ;;  %v3510_v61 = vld [vmem:[%s3710_s2 + $0xec] ss:$16 sps:$4 sm:$0xff]  }
 0x530   :  { %2479 = vpow2.f32 %v2206_v8  ;;  %v3516_v63 = vld [vmem:[%s3710_s2 + $0xe0] ss:$16 sps:$4 sm:$0xff]   ;;  %v3522_v0 = vld [vmem:[%s3710_s2 + $0xe8] ss:$16 sps:$4 sm:$0xff]  }
 0x531   :  { %2481 = vpow2.f32 %v2207_v46  ;;  %v3766_v5 = vld [vmem:[#allocation17_spill] sm:$0xff]  ;;  %v3767_v7 = vld [vmem:[#allocation18_spill] sm:$0xff] }
 0x532   :  { %2483 = vtanh.f32 %v1227_v56  ;;  %v3486_v56 = vld [vmem:[%s3710_s2 + $0xcc] ss:$16 sps:$4 sm:$0xff]  }
 0x539   :  { %v2478_v24 = vpop.eup %2477 }
 0x53a   :  { %v2480_v17 = vpop.eup %2479  ;;  %v1232_v30 = vadd.f32 1.0, %v2478_v24 }
 0x53b   :  { %v1238_v32 = vadd.f32 1.0, %v2480_v17  ;;  %v2482_v44 = vpop.eup %2481  ;;  %v3768_v17 = vld [vmem:[#allocation19_spill] sm:$0xff] }
 0x53c   :  { %2485 = vrcp.f32 %v1232_v30  ;;  %v2484_v15 = vpop.eup %2483  ;;  %v1245_v59 = vadd.f32 1.0, %v2482_v44 }
 0x53d   :  { %2487 = vrcp.f32 %v1238_v32  ;;  %v3769_v32 = vld [vmem:[#allocation20_spill] sm:$0xff] }
 0x53e   :  { %2489 = vrcp.f32 %v1245_v59 }
 0x546   :  { %v2486_v53 = vpop.eup %2485 }
 0x547   :  { %v2488_v33 = vpop.eup %2487  ;;  %v1249_v34 = vmul.f32 %v2486_v53, %v2484_v15 }
 0x548   :  { %v1248_v9 = vmul.f32 %v2488_v33, %v3275_v27  ;;  %v2490_v20 = vpop.eup %2489 }
 0x54a   :  { %v1250_v21 = vadd.f32 %v1249_v34, %v1248_v9 }
 0x54c   :  { %2491 = vtanh.f32 %v1250_v21  ;;  %v3384_v2 = vsel %vm1257_vm12, %v1250_v21, %v3275_v27  ;;  %v3420_v27 = vld [vmem:[%s3710_s2 + $0x60] ss:$16 sps:$4 sm:$0xff]  }
 0x556   :  { %v2492_v22 = vpop.eup %2491 }
 0x557   :  { %v1252_v23 = vmul.f32 %v2492_v22, %v2490_v20 }
 0x559   :  { %v3387_v25 = vsel %vm1257_vm12, %v1252_v23, %v3278_v10  ;;  %v3389_v13 = vsel %vm1257_vm12, %v1252_v23, 0.0  ;;  %v3444_v10 = vld [vmem:[%s3710_s2 + $0x80] ss:$16 sps:$4 sm:$0xff]  }
 0x55a   :  { %v1265_v26 = vpack.c.bf16 %v3387_v25, %v3387_v25 }
 0x55c   :  { %1299 = vmatmul.mubr.bf16.vlgmr.msra.gmra.mrb[36].mxu0 %v1265_v26  ;;  %1340 = vmatmul.mubr.bf16.vlgmr.msra.gmra.mrb[36].mxu1 %v1265_v26 }
 0x55d   :  { %1390 = vmatpush1.bf16.msra.mxu0 %v3287_v37  ;;  %1431 = vmatpush1.bf16.msra.mxu1 %v3293_v54 }
 0x55e   :  { %1391 = vmatprep.subr.bf16.mxu0 %v3299_v28  ;;  %1432 = vmatprep.subr.bf16.mxu1 %v3305_v38 }
 0x55f   :  { %1421 = vmatprep.mubr.bf16.mxu0 %v3754_v19  ;;  %1462 = vmatprep.mubr.bf16.mxu1 %v3754_v19 }
 0x561   :  { %1392 = vmatpush1.bf16.msra.mxu0 %v3313_v39  ;;  %1433 = vmatpush1.bf16.msra.mxu1 %v3319_v40 }
 0x562   :  { %1393 = vmatprep.subr.bf16.mxu0 %v3325_v41  ;;  %1434 = vmatprep.subr.bf16.mxu1 %v3331_v42 }
 0x565   :  { %1394 = vmatpush1.bf16.msra.mxu0 %v3337_v43  ;;  %1435 = vmatpush1.bf16.msra.mxu1 %v3343_v45 }
 0x566   :  { %1395 = vmatprep.subr.bf16.mxu0 %v3408_v62  ;;  %1436 = vmatprep.subr.bf16.mxu1 %v3414_v16 }
 0x569   :  { %1396 = vmatpush1.bf16.msra.mxu0 %v3420_v27  ;;  %1437 = vmatpush1.bf16.msra.mxu1 %v3426_v11 }
 0x56a   :  { %1397 = vmatprep.subr.bf16.mxu0 %v3432_v18  ;;  %1438 = vmatprep.subr.bf16.mxu1 %v3438_v29 }
 0x56d   :  { %1398 = vmatpush1.bf16.msra.mxu0 %v3444_v10  ;;  %1439 = vmatpush1.bf16.msra.mxu1 %v3450_v36 }
 0x56e   :  { %1399 = vmatprep.subr.bf16.mxu0 %v3456_v49  ;;  %1440 = vmatprep.subr.bf16.mxu1 %v3462_v50 }
 0x571   :  { %1400 = vmatpush1.bf16.msra.mxu0 %v3468_v51  ;;  %1441 = vmatpush1.bf16.msra.mxu1 %v3474_v52 }
 0x572   :  { %1401 = vmatprep.subr.bf16.mxu0 %v3480_v55  ;;  %1442 = vmatprep.subr.bf16.mxu1 %v3486_v56 }
 0x575   :  { %1402 = vmatpush1.bf16.msra.mxu0 %v3492_v57  ;;  %1443 = vmatpush1.bf16.msra.mxu1 %v3498_v58 }
 0x576   :  { %1403 = vmatprep.subr.bf16.mxu0 %v3504_v60  ;;  %1444 = vmatprep.subr.bf16.mxu1 %v3510_v61 }
 0x579   :  { %1404 = vmatpush1.bf16.msra.mxu0 %v3516_v63  ;;  %1445 = vmatpush1.bf16.msra.mxu1 %v3522_v0 }
 0x57a   :  { %1512 = vmatprep.subr.bf16.mxu0 %v3369_v47  ;;  %1553 = vmatprep.subr.bf16.mxu1 %v3375_v48 }
 0x62f   :  { %v1300_v3 = vpop.f32.mrb[36].mxu0  ;;  %v1341_v4 = vpop.f32.mrb[36].mxu1 }
 0x630   :  { %v1348_v6 = vadd.f32 %v1300_v3, %v3766_v5  ;;  %v1350_v8 = vadd.f32 %v1341_v4, %v3767_v7  ;;  %v1302_v46 = vpop.f32.mrb[37].mxu0  ;;  %v1343_v24 = vpop.f32.mrb[37].mxu1 }
 0x631   :  { %v1349_v30 = vadd.f32 %v1302_v46, %v3768_v17  ;;  %v1351_v44 = vadd.f32 %v1343_v24, %v3769_v32  ;;  %v1304_v15 = vpop.f32.mrb[38].mxu0  ;;  %v1345_v53 = vpop.f32.mrb[38].mxu1 }
 0x632   :  { %v2208_v33 = vmul.f32 -1.442695, %v1348_v6  ;;  %v1305_v34 = vpop.f32.mrb[39].mxu0  ;;  %v1346_v59 = vpop.f32.mrb[39].mxu1 }
 0x633   :  { %v2209_v47 = vmul.f32 -1.442695, %v1349_v30  ;;  %v2210_v48 = vmul.f32 -1.442695, %v1351_v44  ;;  %v1379_v7 = vpop.permute.xlu1 %1378 }
 0x634   :  { %2493 = vpow2.f32 %v2208_v33  ;;  %vm1380_vm13 = vcmp.eq.s32.totalorder %v1379_v7, 1  ;;  %v3774_v7 = vld [vmem:[#allocation25_spill] sm:$0xff] }
 0x635   :  { %2495 = vpow2.f32 %v2209_v47 }
 0x636   :  { %2497 = vpow2.f32 %v2210_v48 }
 0x637   :  { %2499 = vtanh.f32 %v1350_v8 }
 0x63e   :  { %v2494_v9 = vpop.eup %2493 }
 0x63f   :  { %v2496_v12 = vpop.eup %2495  ;;  %v1355_v21 = vadd.f32 1.0, %v2494_v9  ;;  %v2397_v9 = vld [vmem:[%s3715_s7] sm:$0xff]  }
 0x640   :  { %v1361_v20 = vadd.f32 1.0, %v2496_v12  ;;  %v2498_v22 = vpop.eup %2497  ;;  %v2582_v12 = vmov 0.0  }
 0x641   :  { %2501 = vrcp.f32 %v1355_v21  ;;  %v2500_v23 = vpop.eup %2499  ;;  %v1368_v5 = vadd.f32 1.0, %v2498_v22  ;;  %v2398_v21 = vld [vmem:[%s3715_s7 + $0x8] sm:$0xff]   ;;  %v2400_v22 = vld [vmem:[%s3715_s7 + $0x18] sm:$0xff]  }
 0x642   :  { %2503 = vrcp.f32 %v1361_v20  ;;  %v2399_v20 = vld [vmem:[%s3715_s7 + $0x10] sm:$0xff]  }
 0x643   :  { %2505 = vrcp.f32 %v1368_v5 }
 0x64b   :  { %v2502_v26 = vpop.eup %2501 }
 0x64c   :  { %v2504_v3 = vpop.eup %2503  ;;  %v1372_v4 = vmul.f32 %v2502_v26, %v2500_v23  ;;  %v2401_v23 = vld [vmem:[%s3715_s7 + $0x20] sm:$0xff]   ;;  %v2402_v26 = vld [vmem:[%s3715_s7 + $0x28] sm:$0xff]  }
 0x64d   :  { %v1371_v6 = vmul.f32 %v2504_v3, %v3384_v2  ;;  %v2506_v8 = vpop.eup %2505  ;;  %v2403_v3 = vld [vmem:[%s3715_s7 + $0x30] sm:$0xff]  }
 0x64f   :  { %v1373_v46 = vadd.f32 %v1372_v4, %v1371_v6  ;;  %v2404_v4 = vld [vmem:[%s3715_s7 + $0x38] sm:$0xff]  }
 0x651   :  { %2507 = vtanh.f32 %v1373_v46  ;;  %v3533_v24 = vsel %vm1380_vm13, %v1373_v46, %v3384_v2 }
 0x65b   :  { %v2508_v17 = vpop.eup %2507 }
 0x65c   :  { %v1375_v30 = vmul.f32 %v2508_v17, %v2506_v8 }
 0x65e   :  { %v3536_v32 = vsel %vm1380_vm13, %v1375_v30, %v3387_v25  ;;  %v3538_v44 = vsel %vm1380_vm13, %v1375_v30, 0.0 }
 0x65f   :  { %v1388_v15 = vpack.c.bf16 %v3536_v32, %v3536_v32 }
 0x661   :  { %1422 = vmatmul.mubr.bf16.vlgmr.msra.gmra.mrb[40].mxu0 %v1388_v15  ;;  %1463 = vmatmul.mubr.bf16.vlgmr.msra.gmra.mrb[40].mxu1 %v1388_v15 }
 0x662   :  { %1513 = vmatpush1.bf16.msra.mxu0 %v3287_v37  ;;  %1554 = vmatpush1.bf16.msra.mxu1 %v3293_v54  ;;  %v3770_v54 = vld [vmem:[#allocation21_spill] sm:$0xff] }
 0x663   :  { %1514 = vmatprep.subr.bf16.mxu0 %v3299_v28  ;;  %1555 = vmatprep.subr.bf16.mxu1 %v3305_v38  ;;  %v3771_v38 = vld [vmem:[#allocation22_spill] sm:$0xff] }
 0x664   :  { %1544 = vmatprep.mubr.bf16.mxu0 %v3754_v19  ;;  %1585 = vmatprep.mubr.bf16.mxu1 %v3754_v19 }
 0x666   :  { %1515 = vmatpush1.bf16.msra.mxu0 %v3313_v39  ;;  %1556 = vmatpush1.bf16.msra.mxu1 %v3319_v40 }
 0x667   :  { %1516 = vmatprep.subr.bf16.mxu0 %v3325_v41  ;;  %1557 = vmatprep.subr.bf16.mxu1 %v3331_v42  ;;  %v3772_v42 = vld [vmem:[#allocation23_spill] sm:$0xff] }
 0x66a   :  { %1517 = vmatpush1.bf16.msra.mxu0 %v3337_v43  ;;  %1558 = vmatpush1.bf16.msra.mxu1 %v3343_v45  ;;  %v3773_v45 = vld [vmem:[#allocation24_spill] sm:$0xff] }
 0x66b   :  { %1518 = vmatprep.subr.bf16.mxu0 %v3408_v62  ;;  %1559 = vmatprep.subr.bf16.mxu1 %v3414_v16 }
 0x66e   :  { %1519 = vmatpush1.bf16.msra.mxu0 %v3420_v27  ;;  %1560 = vmatpush1.bf16.msra.mxu1 %v3426_v11 }
 0x66f   :  { %1520 = vmatprep.subr.bf16.mxu0 %v3432_v18  ;;  %1561 = vmatprep.subr.bf16.mxu1 %v3438_v29 }
 0x672   :  { %1521 = vmatpush1.bf16.msra.mxu0 %v3444_v10  ;;  %1562 = vmatpush1.bf16.msra.mxu1 %v3450_v36 }
 0x673   :  { %1522 = vmatprep.subr.bf16.mxu0 %v3456_v49  ;;  %1563 = vmatprep.subr.bf16.mxu1 %v3462_v50 }
 0x676   :  { %1523 = vmatpush1.bf16.msra.mxu0 %v3468_v51  ;;  %1564 = vmatpush1.bf16.msra.mxu1 %v3474_v52 }
 0x677   :  { %1524 = vmatprep.subr.bf16.mxu0 %v3480_v55  ;;  %1565 = vmatprep.subr.bf16.mxu1 %v3486_v56 }
 0x67a   :  { %1525 = vmatpush1.bf16.msra.mxu0 %v3492_v57  ;;  %1566 = vmatpush1.bf16.msra.mxu1 %v3498_v58 }
 0x67b   :  { %1526 = vmatprep.subr.bf16.mxu0 %v3504_v60  ;;  %1567 = vmatprep.subr.bf16.mxu1 %v3510_v61  ;;  %v1502_v60 = vpop.permute.xlu0 %1501 }
 0x67c   :  { %vm1503_vm14 = vcmp.eq.s32.totalorder %v1502_v60, 1 }
 0x67e   :  { %1527 = vmatpush1.bf16.msra.mxu0 %v3516_v63  ;;  %1568 = vmatpush1.bf16.msra.mxu1 %v3522_v0 }
 0x67f   :  { %2252 = vmatprep.subr.bf16.mxu0 %v2582_v12  ;;  %2272 = vmatprep.subr.bf16.mxu1 %v2582_v12 }
 0x734   :  { %v1423_v19 = vpop.f32.mrb[40].mxu0  ;;  %v1464_v37 = vpop.f32.mrb[40].mxu1 }
 0x735   :  { %v1471_v28 = vadd.f32 %v1423_v19, %v3770_v54  ;;  %v1473_v39 = vadd.f32 %v1464_v37, %v3771_v38  ;;  %v1425_v40 = vpop.f32.mrb[41].mxu0  ;;  %v1466_v41 = vpop.f32.mrb[41].mxu1  ;;  %v3777_v19 = vld [vmem:[#allocation28_spill] sm:$0xff] }
 0x736   :  { %v1472_v43 = vadd.f32 %v1425_v40, %v3772_v42  ;;  %v1474_v2 = vadd.f32 %v1466_v41, %v3773_v45  ;;  %v1427_v25 = vpop.f32.mrb[42].mxu0  ;;  %v1468_v62 = vpop.f32.mrb[42].mxu1 }
 0x737   :  { %v2211_v16 = vmul.f32 -1.442695, %v1471_v28  ;;  %v1428_v27 = vpop.f32.mrb[43].mxu0  ;;  %v1469_v11 = vpop.f32.mrb[43].mxu1 }
 0x738   :  { %v2212_v18 = vmul.f32 -1.442695, %v1472_v43  ;;  %v2213_v29 = vmul.f32 -1.442695, %v1474_v2 }
 0x739   :  { %2509 = vpow2.f32 %v2211_v16 }
 0x73a   :  { %2511 = vpow2.f32 %v2212_v18 }
 0x73b   :  { %2513 = vpow2.f32 %v2213_v29 }
 0x73c   :  { %2515 = vtanh.f32 %v1473_v39 }
 0x743   :  { %v2510_v10 = vpop.eup %2509 }
 0x744   :  { %v2512_v36 = vpop.eup %2511  ;;  %v1478_v49 = vadd.f32 1.0, %v2510_v10 }
 0x745   :  { %v1484_v50 = vadd.f32 1.0, %v2512_v36  ;;  %v2514_v51 = vpop.eup %2513 }
 0x746   :  { %2517 = vrcp.f32 %v1478_v49  ;;  %v2516_v52 = vpop.eup %2515  ;;  %v1491_v58 = vadd.f32 1.0, %v2514_v51 }
 0x747   :  { %2519 = vrcp.f32 %v1484_v50  ;;  %v1625_v50 = vpop.permute.xlu1 %1624 }
 0x748   :  { %2521 = vrcp.f32 %v1491_v58  ;;  %vm1626_vm0 = vcmp.eq.s32.totalorder %v1625_v50, 1  ;;  %v2406_v50 = vld [vmem:[%s3717_s8 + $0x8] sm:$0xff]  }
 0x750   :  { %v2518_v55 = vpop.eup %2517 }
 0x751   :  { %v2520_v56 = vpop.eup %2519  ;;  %v1495_v57 = vmul.f32 %v2518_v55, %v2516_v52 }
 0x752   :  { %v1494_v61 = vmul.f32 %v2520_v56, %v3533_v24  ;;  %v2522_v53 = vpop.eup %2521 }
 0x754   :  { %v1496_v63 = vadd.f32 %v1495_v57, %v1494_v61 }
 0x756   :  { %2523 = vtanh.f32 %v1496_v63  ;;  %v3580_v0 = vsel %vm1503_vm14, %v1496_v63, %v3533_v24  ;;  %v3775_v24 = vld [vmem:[#allocation26_spill] sm:$0xff] }
 0x760   :  { %v2524_v33 = vpop.eup %2523 }
 0x761   :  { %v1498_v34 = vmul.f32 %v2524_v33, %v2522_v53 }
 0x763   :  { %v3583_v59 = vsel %vm1503_vm14, %v1498_v34, %v3536_v32  ;;  %v3585_v47 = vsel %vm1503_vm14, %v1498_v34, 0.0  ;;  %v3776_v32 = vld [vmem:[#allocation27_spill] sm:$0xff] }
 0x764   :  { %v1511_v48 = vpack.c.bf16 %v3583_v59, %v3583_v59 }
 0x766   :  { %1545 = vmatmul.mubr.bf16.vlgmr.msra.gmra.mrb[44].mxu0 %v1511_v48  ;;  %1586 = vmatmul.mubr.bf16.vlgmr.msra.gmra.mrb[44].mxu1 %v1511_v48 }
 0x767   :  { %2253 = vmatpush3.bf16.msra.mxu0 %v2397_v9  ;;  %2268 = vmatprep.mubr.msk.bf16.mxu0 %vm2583_vm15, %v2582_v12 }
 0x768   :  { %2254 = vmatprep.subr.bf16.mxu0 %v2582_v12  ;;  %2288 = vmatprep.mubr.msk.bf16.mxu1 %vm2583_vm15, %v2582_v12 }
 0x76b   :  { %2255 = vmatpush3.bf16.msra.mxu0 %v2398_v21 }
 0x76c   :  { %2256 = vmatprep.subr.bf16.mxu0 %v2582_v12 }
 0x76f   :  { %2257 = vmatpush3.bf16.msra.mxu0 %v2399_v20  ;;  %v3778_v20 = vlaneseq }
 0x770   :  { %2258 = vmatprep.subr.bf16.mxu0 %v2582_v12 }
 0x773   :  { %2259 = vmatpush3.bf16.msra.mxu0 %v2400_v22  ;;  %v1785_v22 = vand.u32 127, %v3778_v20 }
 0x774   :  { %2260 = vmatprep.subr.bf16.mxu0 %v2582_v12 }
 0x777   :  { %2261 = vmatpush3.bf16.msra.mxu0 %v2401_v23 }
 0x778   :  { %2262 = vmatprep.subr.bf16.mxu0 %v2582_v12 }
 0x77b   :  { %2263 = vmatpush3.bf16.msra.mxu0 %v2402_v26  ;;  %v3779_v26 = vld [vmem:[#allocation5_spill] sm:$0xff] }
 0x77c   :  { %2264 = vmatprep.subr.bf16.mxu0 %v2582_v12  ;;  %v1939_v20 = vsub.s32 4, %v3779_v26 }
 0x77f   :  { %2265 = vmatpush3.bf16.msra.mxu0 %v2403_v3  ;;  %v1788_v3 = vsub.s32 %v1785_v22, %v3779_v26  ;;  %v2412_v22 = vld [vmem:[%s3717_s8 + $0x38] sm:$0xff]  }
 0x780   :  { %2266 = vmatprep.subr.bf16.mxu0 %v2582_v12 }
 0x783   :  { %2267 = vmatpush3.bf16.msra.mxu0 %v2404_v4 }
 0x839   :  { %v1546_v5 = vpop.f32.mrb[44].mxu0  ;;  %v1587_v6 = vpop.f32.mrb[44].mxu1 }
 0x83a   :  { %v1594_v46 = vadd.f32 %v1546_v5, %v3774_v7  ;;  %v1596_v8 = vadd.f32 %v1587_v6, %v3775_v24  ;;  %v1548_v17 = vpop.f32.mrb[45].mxu0  ;;  %v1589_v30 = vpop.f32.mrb[45].mxu1 }
 0x83b   :  { %v1595_v15 = vadd.f32 %v1548_v17, %v3776_v32  ;;  %v1597_v37 = vadd.f32 %v1589_v30, %v3777_v19  ;;  %v1550_v54 = vpop.f32.mrb[46].mxu0  ;;  %v1591_v28 = vpop.f32.mrb[46].mxu1 }
 0x83c   :  { %v2214_v38 = vmul.f32 -1.442695, %v1594_v46  ;;  %v1551_v39 = vpop.f32.mrb[47].mxu0  ;;  %v1592_v40 = vpop.f32.mrb[47].mxu1 }
 0x83d   :  { %v2215_v41 = vmul.f32 -1.442695, %v1595_v15  ;;  %v2216_v42 = vmul.f32 -1.442695, %v1597_v37 }
 0x83e   :  { %2525 = vpow2.f32 %v2214_v38 }
 0x83f   :  { %2527 = vpow2.f32 %v2215_v41 }
 0x840   :  { %2529 = vpow2.f32 %v2216_v42 }
 0x841   :  { %2531 = vtanh.f32 %v1596_v8 }
 0x848   :  { %v2526_v43 = vpop.eup %2525 }
 0x849   :  { %v2528_v45 = vpop.eup %2527  ;;  %v1601_v2 = vadd.f32 1.0, %v2526_v43 }
 0x84a   :  { %v1607_v25 = vadd.f32 1.0, %v2528_v45  ;;  %v2530_v62 = vpop.eup %2529 }
 0x84b   :  { %2533 = vrcp.f32 %v1601_v2  ;;  %v2532_v16 = vpop.eup %2531  ;;  %v1614_v29 = vadd.f32 1.0, %v2530_v62 }
 0x84c   :  { %2535 = vrcp.f32 %v1607_v25 }
 0x84d   :  { %2537 = vrcp.f32 %v1614_v29 }
 0x855   :  { %v2534_v27 = vpop.eup %2533 }
 0x856   :  { %v2536_v11 = vpop.eup %2535  ;;  %v1618_v18 = vmul.f32 %v2534_v27, %v2532_v16 }
 0x857   :  { %v1617_v10 = vmul.f32 %v2536_v11, %v3580_v0  ;;  %v2538_v49 = vpop.eup %2537 }
 0x859   :  { %v1619_v36 = vadd.f32 %v1618_v18, %v1617_v10 }
 0x85b   :  { %2539 = vtanh.f32 %v1619_v36 }
 0x865   :  { %v2540_v51 = vpop.eup %2539 }
 0x866   :  { %v1621_v52 = vmul.f32 %v2540_v51, %v2538_v49  ;;  %v2405_v49 = vld [vmem:[%s3717_s8] sm:$0xff]   ;;  %v2407_v51 = vld [vmem:[%s3717_s8 + $0x10] sm:$0xff]  }
 0x867   :  { %2273 = vmatpush3.bf16.msra.mxu1 %v2405_v49 }
 0x868   :  { %v1627_v55 = vsel %vm1626_vm0, %v1621_v52, %v3583_v59  ;;  %v3630_v56 = vsel %vm1626_vm0, %v1621_v52, 0.0  ;;  %2274 = vmatprep.subr.bf16.mxu1 %v2582_v12  ;;  %v2408_v52 = vld [vmem:[%s3717_s8 + $0x18] sm:$0xff]  }
 0x869   :  { %v1647_v57 = vpack.c.bf16 %v1627_v55, %v1627_v55 }
 0x86b   :  { %2269 = vmatmul.mubr.bf16.vlgmr.msra.gmra.mrb[48].mxu0 %v1647_v57  ;;  %2275 = vmatpush3.bf16.msra.mxu1 %v2406_v50  ;;  %v2409_v57 = vld [vmem:[%s3717_s8 + $0x20] sm:$0xff]  }
 0x86c   :  { %2276 = vmatprep.subr.bf16.mxu1 %v2582_v12 }
 0x86f   :  { %2277 = vmatpush3.bf16.msra.mxu1 %v2407_v51 }
 0x870   :  { %2278 = vmatprep.subr.bf16.mxu1 %v2582_v12 }
 0x873   :  { %2279 = vmatpush3.bf16.msra.mxu1 %v2408_v52 }
 0x874   :  { %2280 = vmatprep.subr.bf16.mxu1 %v2582_v12 }
 0x877   :  { %2281 = vmatpush3.bf16.msra.mxu1 %v2409_v57 }
 0x878   :  { %2282 = vmatprep.subr.bf16.mxu1 %v2582_v12 }
 0x93e   :  { %v1746_v58 = vpop.f32.mrb[48].mxu0 }
 0x93f   :  { %v2270_v60 = vpop.f32.mrb[49].mxu0  ;;  %v1753_v61 = vmul.f32 %v1746_v58, %v3182_v14  ;;  %v1752_v63 = vmul.f32 %v1746_v58, %v3125_v31  ;;  %v1756_v33 = vmul.f32 %v1746_v58, %v3389_v13  ;;  %v1754_v34 = vmul.f32 %v1746_v58, %v3231_v35 }
 0x940   :  { %v1749_v0 = vpop.f32.mrb[50].mxu0  ;;  %v1758_v59 = vmul.f32 %v1746_v58, %v3585_v47  ;;  %v1755_v48 = vmul.f32 %v1746_v58, %v3280_v1  ;;  %v1757_v9 = vmul.f32 %v1746_v58, %v3538_v44  ;;  %v1759_v21 = vmul.f32 %v1746_v58, %v3630_v56 }
 0x941   :  { %1762 = vadd.xlane.f32.xlu1 %v1753_v61  ;;  %1760 = vadd.xlane.f32.xlu0 %v1752_v63  ;;  %v2271_v53 = vpop.f32.mrb[51].mxu0  ;;  %v3780_v58 = vsub.s32 1, %v3779_v26  ;;  %v3781_v61 = vsub.s32 0, %v3779_v26  ;;  %v1953_v0 = vsub.s32 6, %v3779_v26 }
 0x942   :  { %v2410_v53 = vld [vmem:[%s3717_s8 + $0x28] sm:$0xff]  }
 0x943   :  { %2283 = vmatpush3.bf16.msra.mxu1 %v2410_v53 }
 0x944   :  { %2284 = vmatprep.subr.bf16.mxu1 %v2582_v12 }
 0x945   :  { %1768 = vadd.xlane.f32.xlu1 %v1756_v33  ;;  %1764 = vadd.xlane.f32.xlu0 %v1754_v34  ;;  %v3782_v34 = vsub.s32 2, %v3779_v26 }
 0x949   :  { %1772 = vadd.xlane.f32.xlu1 %v1758_v59  ;;  %1766 = vadd.xlane.f32.xlu0 %v1755_v48  ;;  %v2411_v48 = vld [vmem:[%s3717_s8 + $0x30] sm:$0xff]  }
 0x94a   :  { %2285 = vmatpush3.bf16.msra.mxu1 %v2411_v48 }
 0x94b   :  { %2286 = vmatprep.subr.bf16.mxu1 %v2582_v12 }
 0x94d   :  { %1770 = vadd.xlane.f32.xlu0 %v1757_v9  ;;  %v3783_v9 = vsub.s32 3, %v3779_v26 }
 0x94e   :  { %2287 = vmatpush3.bf16.msra.mxu1 %v2412_v22 }
 0x951   :  { %1774 = vadd.xlane.f32.xlu0 %v1759_v21 }
 0x9ce   :  { %v1761_v23 = vpop.xlane.xlu0 %1760  ;;  %v1763_v4 = vpop.xlane.xlu1 %1762 }
 0x9cf   :  { %v1793_v6 = vrot.slane %v1763_v4, %v1788_v3  ;;  %v1789_v7 = vrot.slane %v1761_v23, %v1788_v3 }
 0x9d1   :  { %v1819_v17 = vsel %vm1818_vm1, %v1793_v6, %v1789_v7 }
 0x9d2   :  { %v1765_v5 = vpop.xlane.xlu0 %1764  ;;  %v1769_v24 = vpop.xlane.xlu1 %1768 }
 0x9d3   :  { %v1797_v46 = vrot.slane %v1765_v5, %v1788_v3  ;;  %v1805_v19 = vrot.slane %v1769_v24, %v1788_v3  ;;  %v1960_v5 = vsub.s32 7, %v3779_v26 }
 0x9d5   :  { %v1821_v32 = vsel %vm1820_vm2, %v1797_v46, %v1819_v17 }
 0x9d6   :  { %v1767_v8 = vpop.xlane.xlu0 %1766  ;;  %v1773_v54 = vpop.xlane.xlu1 %1772 }
 0x9d7   :  { %v1801_v30 = vrot.slane %v1767_v8, %v1788_v3  ;;  %v1813_v40 = vrot.slane %v1773_v54, %v1788_v3 }
 0x9d9   :  { %v1823_v15 = vsel %vm1822_vm3, %v1801_v30, %v1821_v32 }
 0x9da   :  { %v1771_v37 = vpop.xlane.xlu0 %1770  ;;  %v1825_v38 = vsel %vm1824_vm4, %v1805_v19, %v1823_v15 }
 0x9db   :  { %v1809_v28 = vrot.slane %v1771_v37, %v1788_v3 }
 0x9dd   :  { %v1827_v39 = vsel %vm1826_vm5, %v1809_v28, %v1825_v38 }
 0x9de   :  { %v1775_v41 = vpop.xlane.xlu0 %1774  ;;  %v1829_v43 = vsel %vm1828_vm6, %v1813_v40, %v1827_v39 }
 0x9df   :  { %v1817_v42 = vrot.slane %v1775_v41, %v1788_v3  ;;  %v1946_v3 = vsub.s32 5, %v3779_v26 }
 0x9e1   :  { %v1831_v45 = vsel %vm1830_vm7, %v1817_v42, %v1829_v43 }
 0x9e2   :  { %1833 = vxpose.xlu1.b32.start.end [1/1] (short) (narrow) %v1831_v45, 8 }
 0xa62   :  { %v1849_v2 = vpop.trf.xlu1 }
 0xa63   :  { %v1866_v25 = vsel %vm1865_vm8, %v1849_v2, -inf }
 0xa64   :  { %1867 = vmax.xlane.f32.xlu0 %v1866_v25 }
 0xaf1   :  { %v1868_v62 = vpop.xlane.xlu0 %1867 }
 0xaf2   :  { %v1869_v16 = vsub.f32 %v1849_v2, %v1868_v62 }
 0xaf4   :  { %v1870_v27 = vmul.f32 1.442695, %v1869_v16 }
 0xaf6   :  { %2541 = vpow2.f32 %v1870_v27 }
 0xb00   :  { %v2542_v11 = vpop.eup %2541 }
 0xb01   :  { %v1872_v18 = vsel %vm1865_vm8, %v2542_v11, 0.0 }
 0xb02   :  { %1873 = vadd.xlane.f32.xlu0 %v1872_v18 }
 0xb8f   :  { %v1874_v29 = vpop.xlane.xlu0 %1873 }
 0xb90   :  { %2543 = vrcp.f32 %v1874_v29 }
 0xb9a   :  { %v2544_v10 = vpop.eup %2543 }
 0xb9b   :  { %v1876_v36 = vmul.f32 %v2544_v10, %v2542_v11 }
 0xb9d   :  { %1877 = vxpose.xlu0.b32.start.end [1/1] (short) (narrow) %v1876_v36, 8  ;;  %2105 = vst.msk [vmem:[%s3716_s12] sm:$0xff] %vm1865_vm8, %v1876_v36 }
 0xc1d   :  { %v1893_v55 = vpop.trf.xlu0 }
 0xc1e   :  { %v1919_v60 = vrot.slane %v1893_v55, %v3780_v58  ;;  %v1912_v63 = vrot.slane %v1893_v55, %v3781_v61  ;;  %v1954_v33 = vrot.slane %v1893_v55, %v1953_v0  ;;  %v1926_v59 = vrot.slane %v1893_v55, %v3782_v34 }
 0xc1f   :  { %v1933_v21 = vrot.slane %v1893_v55, %v3783_v9  ;;  %v1940_v23 = vrot.slane %v1893_v55, %v1939_v20  ;;  %v1947_v4 = vrot.slane %v1893_v55, %v1946_v3  ;;  %v1961_v6 = vrot.slane %v1893_v55, %v1960_v5 }
 0xc20   :  { %1921 = vbcast.lane.b32.xlu0 %v1919_v60, 256  ;;  %1914 = vbcast.lane.b32.xlu1 %v1912_v63, 256 }
 0xc24   :  { %1956 = vbcast.lane.b32.xlu0 %v1954_v33, 256  ;;  %1928 = vbcast.lane.b32.xlu1 %v1926_v59, 256 }
 0xc28   :  { %1935 = vbcast.lane.b32.xlu1 %v1933_v21, 256 }
 0xc2c   :  { %1942 = vbcast.lane.b32.xlu1 %v1940_v23, 256 }
 0xc30   :  { %1949 = vbcast.lane.b32.xlu1 %v1947_v4, 256 }
 0xc34   :  { %1963 = vbcast.lane.b32.xlu1 %v1961_v6, 256 }
 0xc92   :  { %v1915_v7 = vpop.permute.xlu1 %1914  ;;  %v1922_v46 = vpop.permute.xlu0 %1921 }
 0xc93   :  { %v1966_v12 = vmul.f32 %v1922_v46, %v3182_v14  ;;  %v1965_v8 = vmul.f32 %v1915_v7, %v3125_v31 }
 0xc95   :  { %v1973_v32 = vadd.f32 %v1966_v12, %v1965_v8 }
 0xc96   :  { %v1929_v24 = vpop.permute.xlu1 %1928  ;;  %v1957_v28 = vpop.permute.xlu0 %1956 }
 0xc97   :  { %v1967_v30 = vmul.f32 %v1929_v24, %v3231_v35  ;;  %v1971_v14 = vmul.f32 %v1957_v28, %v3585_v47 }
 0xc99   :  { %v1974_v37 = vadd.f32 %v1973_v32, %v1967_v30 }
 0xc9a   :  { %v1936_v17 = vpop.permute.xlu1 %1935 }
 0xc9b   :  { %v1968_v15 = vmul.f32 %v1936_v17, %v3280_v1  ;;  %v2225_v1 = vld [vmem:[%s3719_s9] ss:$0 sm:$0xff] }
 0xc9d   :  { %v1975_v54 = vadd.f32 %v1974_v37, %v1968_v15 }
 0xc9e   :  { %v1943_v19 = vpop.permute.xlu1 %1942 }
 0xc9f   :  { %v1969_v26 = vmul.f32 %v1943_v19, %v3389_v13 }
 0xca1   :  { %v1976_v39 = vadd.f32 %v1975_v54, %v1969_v26 }
 0xca2   :  { %v1950_v38 = vpop.permute.xlu1 %1949 }
 0xca3   :  { %v1970_v40 = vmul.f32 %v1950_v38, %v3538_v44 }
 0xca5   :  { %v1977_v41 = vadd.f32 %v1976_v39, %v1970_v40 }
 0xca6   :  { %v1964_v31 = vpop.permute.xlu1 %1963 }
 0xca7   :  { %v1978_v42 = vadd.f32 %v1977_v41, %v1971_v14  ;;  %v1972_v35 = vmul.f32 %v1964_v31, %v3630_v56 }
 0xca9   :  { %v1979_v43 = vadd.f32 %v1978_v42, %v1972_v35 }
 0xcab   :  { %v1980_v45 = vpack.c.bf16 %v1979_v43, %v1979_v43  ;;  %2104 = vst [vmem:[%s3718_s11] sm:$0xff] %v1979_v43 }
 0xcad   :  { %2289 = vmatmul.mubr.bf16.vlgmr.msra.gmra.mrb[48].mxu1 %v1980_v45 }
 0xd80   :  { %v2086_v13 = vpop.f32.mrb[48].mxu1 }
 0xd81   :  { %v2087_v44 = vadd.f32 %v2225_v1, %v2086_v13  ;;  %v2290_v2 = vpop.f32.mrb[49].mxu1 }
 0xd82   :  { %v2089_v47 = vpop.f32.mrb[50].mxu1 }
 0xd83   :  { %2092 = vmax.xlane.f32.xlu0 %v2087_v44  ;;  %v2291_v25 = vpop.f32.mrb[51].mxu1 }
 0xe10   :  { %v2093_v62 = vpop.xlane.xlu0 %2092 }
 0xe11   :  { %v2094_v16 = vsub.f32 %v2087_v44, %v2093_v62 }
 0xe13   :  { %v2095_v56 = vmul.f32 1.442695, %v2094_v16 }
 0xe15   :  { %2545 = vpow2.f32 %v2095_v56 }
 0xe1f   :  { %v2546_v27 = vpop.eup %2545 }
 0xe20   :  { %2097 = vadd.xlane.f32.xlu1 %v2546_v27 }
 0xead   :  { %v2098_v11 = vpop.xlane.xlu1 %2097 }
 0xeae   :  { %2547 = vlog2.f32 %v2098_v11 }
 0xeb8   :  { %v2548_v18 = vpop.eup %2547 }
 0xeb9   :  { %v2100_v29 = vmul.f32 0.6931472, %v2548_v18 }
 0xebb   :  { %v2101_v10 = vadd.f32 %v2100_v29, %v2093_v62 }
 0xebd   :  { %v2102_v36 = vsub.f32 %v2087_v44, %v2101_v10 }
 0xebf   :  { %2103 = vst [vmem:[%s3720_s10] sm:$0xff] %v2102_v36 }

</bundles_post_ra>
